<compile_context>
chip_gen: v7x
topology: tpu7x:2x2x1
jax: 0.10.0
libtpu: 0.0.40
codegen_flags: <defaults>
</compile_context>

<pallas_src>
import functools

import jax
import jax.numpy as jnp
from jax.experimental import pallas as pl
from jax.experimental.pallas import tpu as pltpu

_VMEM_LIMIT = 48 * 1024 * 1024  # explicit scoped-VMEM cap (fits v5e/v6e/v7x)


# ----------------------------------------------------------------------------
# Helpers: padding / tile sizing
# ----------------------------------------------------------------------------
def _round_up(x, m):
    return ((x + m - 1) // m) * m


def _pad2d(x, rows, cols):
    r, c = x.shape
    if r == rows and c == cols:
        return x
    return jnp.pad(x, ((0, rows - r), (0, cols - c)))


# ----------------------------------------------------------------------------
# Pallas kernels
# ----------------------------------------------------------------------------
def _mm_kernel(a_ref, b_ref, o_ref, acc_ref, *, relu, scale):
    k = pl.program_id(2)

    @pl.when(k == 0)
    def _():
        acc_ref[...] = jnp.zeros_like(acc_ref)

    acc_ref[...] += jnp.dot(a_ref[...], b_ref[...],
                            preferred_element_type=jnp.float32)

    @pl.when(k == pl.num_programs(2) - 1)
    def _():
        r = acc_ref[...]
        if scale is not None:
            r = r * scale
        if relu:
            r = jnp.maximum(r, 0.0)
        o_ref[...] = r.astype(o_ref.dtype)


def _dual_mm_kernel(a1_ref, b1_ref, a2_ref, b2_ref, o_ref, acc_ref, *, scale):
    # o = (a1 @ b1 + a2 @ b2) * scale, single accumulator / single store.
    k = pl.program_id(2)

    @pl.when(k == 0)
    def _():
        acc_ref[...] = jnp.zeros_like(acc_ref)

    acc_ref[...] += jnp.dot(a1_ref[...], b1_ref[...],
                            preferred_element_type=jnp.float32)
    acc_ref[...] += jnp.dot(a2_ref[...], b2_ref[...],
                            preferred_element_type=jnp.float32)

    @pl.when(k == pl.num_programs(2) - 1)
    def _():
        r = acc_ref[...]
        if scale is not None:
            r = r * scale
        o_ref[...] = r.astype(o_ref.dtype)


def _gcn_highway_kernel(adj_ref, xk_ref, x1_ref, w_ref, b_ref, o_ref, acc_ref):
    # Accumulate adj @ x over K; epilogue: relu, then Highway gate
    #   gate = sigmoid(x1 @ W^T + b);  out = gate * relu(adj@x) + (1-gate) * x1
    # (gate math kept in f32; matmul operands bf16, MXU accumulates in f32).
    k = pl.program_id(1)

    @pl.when(k == 0)
    def _():
        acc_ref[...] = jnp.zeros_like(acc_ref)

    acc_ref[...] += jnp.dot(adj_ref[...], xk_ref[...],
                            preferred_element_type=jnp.float32)

    @pl.when(k == pl.num_programs(1) - 1)
    def _():
        x2 = jnp.maximum(acc_ref[...], 0.0)
        x1 = x1_ref[...].astype(jnp.float32)
        lin = jnp.dot(x1_ref[...], w_ref[...],
                      preferred_element_type=jnp.float32) + b_ref[...]
        gate = jax.nn.sigmoid(lin)
        o_ref[...] = (gate * x2 + (1.0 - gate) * x1).astype(o_ref.dtype)


# ----------------------------------------------------------------------------
# Pallas wrappers (pad -> tile -> slice)
# ----------------------------------------------------------------------------
def pallas_matmul(a, b, *, relu=False, scale=None, tm=256, tn=256, tk=256):
    """Tiled bf16 (M,K)@(K,N) -> f32 (M,N) with f32 VMEM accumulator."""
    M, K = a.shape
    K2, N = b.shape
    assert K == K2
    tm = min(tm, _round_up(M, 8))
    tn = min(tn, _round_up(N, 128))
    tk = min(tk, _round_up(K, 128))
    Mp, Np, Kp = _round_up(M, tm), _round_up(N, tn), _round_up(K, tk)

    a_p = _pad2d(a.astype(jnp.bfloat16), Mp, Kp)
    b_p = _pad2d(b.astype(jnp.bfloat16), Kp, Np)

    out = pl.pallas_call(
        functools.partial(_mm_kernel, relu=relu, scale=scale),
        grid_spec=pltpu.PrefetchScalarGridSpec(
            num_scalar_prefetch=0,
            grid=(Mp // tm, Np // tn, Kp // tk),
            in_specs=[pl.BlockSpec((tm, tk), lambda i, j, k: (i, k)),
                      pl.BlockSpec((tk, tn), lambda i, j, k: (k, j))],
            out_specs=pl.BlockSpec((tm, tn), lambda i, j, k: (i, j)),
            scratch_shapes=[pltpu.VMEM((tm, tn), jnp.float32)]),
        out_shape=jax.ShapeDtypeStruct((Mp, Np), jnp.float32),
        compiler_params=pltpu.CompilerParams(
            dimension_semantics=("parallel", "parallel", "arbitrary"),
            vmem_limit_bytes=_VMEM_LIMIT),
    )(a_p, b_p)
    return out[:M, :N]


def pallas_dual_matmul(a1, b1, a2, b2, *, scale=None, tm=256, tn=256, tk=256):
    """(a1 @ b1 + a2 @ b2) * scale in one kernel (shared accumulator)."""
    M, K = a1.shape
    _, N = b1.shape
    assert a2.shape == (M, K) and b2.shape == (K, N)
    tm = min(tm, _round_up(M, 8))
    tn = min(tn, _round_up(N, 128))
    tk = min(tk, _round_up(K, 128))
    Mp, Np, Kp = _round_up(M, tm), _round_up(N, tn), _round_up(K, tk)

    a1_p = _pad2d(a1.astype(jnp.bfloat16), Mp, Kp)
    a2_p = _pad2d(a2.astype(jnp.bfloat16), Mp, Kp)
    b1_p = _pad2d(b1.astype(jnp.bfloat16), Kp, Np)
    b2_p = _pad2d(b2.astype(jnp.bfloat16), Kp, Np)

    out = pl.pallas_call(
        functools.partial(_dual_mm_kernel, scale=scale),
        grid_spec=pltpu.PrefetchScalarGridSpec(
            num_scalar_prefetch=0,
            grid=(Mp // tm, Np // tn, Kp // tk),
            in_specs=[pl.BlockSpec((tm, tk), lambda i, j, k: (i, k)),
                      pl.BlockSpec((tk, tn), lambda i, j, k: (k, j)),
                      pl.BlockSpec((tm, tk), lambda i, j, k: (i, k)),
                      pl.BlockSpec((tk, tn), lambda i, j, k: (k, j))],
            out_specs=pl.BlockSpec((tm, tn), lambda i, j, k: (i, j)),
            scratch_shapes=[pltpu.VMEM((tm, tn), jnp.float32)]),
        out_shape=jax.ShapeDtypeStruct((Mp, Np), jnp.float32),
        compiler_params=pltpu.CompilerParams(
            dimension_semantics=("parallel", "parallel", "arbitrary"),
            vmem_limit_bytes=_VMEM_LIMIT),
    )(a1_p, b1_p, a2_p, b2_p)
    return out[:M, :N]


def pallas_gcn_highway(adj, x, w_t, b, *, tm=256, tk=256):
    """Fused relu(adj @ x) + Highway(x, .) -- one kernel, one output store."""
    N = adj.shape[0]
    _, D = x.shape
    Dp = _round_up(D, 128)
    tm = min(tm, _round_up(N, 8))
    tk = min(tk, _round_up(N, 128))
    Mp, Kp = _round_up(N, tm), _round_up(N, tk)

    adj_p = _pad2d(adj.astype(jnp.bfloat16), Mp, Kp)
    xk_p = _pad2d(x.astype(jnp.bfloat16), Kp, Dp)
    x1_p = _pad2d(x.astype(jnp.bfloat16), Mp, Dp)
    w_p = _pad2d(w_t.astype(jnp.bfloat16), Dp, Dp)
    b_p = _pad2d(b.reshape(1, -1).astype(jnp.float32), 1, Dp)

    out = pl.pallas_call(
        _gcn_highway_kernel,
        grid_spec=pltpu.PrefetchScalarGridSpec(
            num_scalar_prefetch=0,
            grid=(Mp // tm, Kp // tk),
            in_specs=[
                pl.BlockSpec((tm, tk), lambda i, k: (i, k)),   # adj tile
                pl.BlockSpec((tk, Dp), lambda i, k: (k, 0)),   # x rows (K step)
                pl.BlockSpec((tm, Dp), lambda i, k: (i, 0)),   # x1 rows (gate)
                pl.BlockSpec((Dp, Dp), lambda i, k: (0, 0)),   # W^T resident
                pl.BlockSpec((1, Dp), lambda i, k: (0, 0)),    # bias resident
            ],
            out_specs=pl.BlockSpec((tm, Dp), lambda i, k: (i, 0)),
            scratch_shapes=[pltpu.VMEM((tm, Dp), jnp.float32)]),
        out_shape=jax.ShapeDtypeStruct((Mp, Dp), jnp.float32),
        compiler_params=pltpu.CompilerParams(
            dimension_semantics=("parallel", "arbitrary"),
            vmem_limit_bytes=_VMEM_LIMIT),
    )(adj_p, xk_p, x1_p, w_p, b_p)
    return out[:N, :D]


# ----------------------------------------------------------------------------
# JAX glue: segment softmax (torch_geometric.utils.softmax semantics),
# vectorized over a trailing head axis.
# ----------------------------------------------------------------------------
def segment_softmax(e, index, num_segments):
    seg_max = jax.ops.segment_max(e, index, num_segments=num_segments)
    seg_max = jnp.where(jnp.isfinite(seg_max), seg_max, 0.0)
    ex = jnp.exp(e - seg_max[index])
    seg_sum = jax.ops.segment_sum(ex, index, num_segments=num_segments)
    return ex / (seg_sum[index] + 1e-16)


def leaky_relu(x):
    return jax.nn.leaky_relu(x, negative_slope=0.01)


# ----------------------------------------------------------------------------
# Sub-modules
# ----------------------------------------------------------------------------
def build_gcn_adj(edge_index_all, n):
    # Normalized GCN adjacency; depends only on edge_index_all, so it is built
    # once and reused by both GCN+Highway layers.
    j, i = edge_index_all[0], edge_index_all[1]
    deg = jax.ops.segment_sum(jnp.ones(i.shape, jnp.float32), i, num_segments=n)
    deg_inv_sqrt = jnp.where(deg > 0, jax.lax.rsqrt(deg), 0.0)  # zero-deg guard
    norm = deg_inv_sqrt[j] * deg_inv_sqrt[i]
    # spmm(edge_index[[1,0]], norm, n, n, x): out[i] += norm * x[j]
    return jnp.zeros((n, n), jnp.float32).at[i, j].add(norm)


def gcn_highway_forward(hw_params, adj, x):
    # GCN aggregation fused with the following Highway gate (one kernel).
    return pallas_gcn_highway(adj, x, hw_params["W"].T, hw_params["b"])


def e2r_forward(p, x_e, edge_index, rel, num_rel, num_heads):
    h, t = edge_index[0], edge_index[1]
    n = x_e.shape[0]
    r_hidden = p["w_h"].shape[0]

    # Fused feature projection: x_e @ [w_h^T | w_t^T]  -> (N, 2*r_hidden)
    proj = pallas_matmul(x_e, jnp.concatenate([p["w_h"].T, p["w_t"].T], axis=1))
    x_r_h = proj[:, :r_hidden]
    x_r_t = proj[:, r_hidden:]

    # Fused attention-score projection (4 tiny matmuls -> 1 lane-dense call):
    # rows [x_r_h ; x_r_t], cols [a_h^T | a_t^T]  ->  (2N, 2H)
    a_h = p["a_h"][:num_heads]
    a_t = p["a_t"][:num_heads]
    s = pallas_matmul(jnp.concatenate([x_r_h, x_r_t], axis=0),
                      jnp.concatenate([a_h.T, a_t.T], axis=1))
    s_hh = s[:n, :num_heads]   # a_h(x_r_h)  (N, H)
    s_th = s[:n, num_heads:]   # a_t(x_r_h)
    s_ht = s[n:, :num_heads]   # a_h(x_r_t)
    s_tt = s[n:, num_heads:]   # a_t(x_r_t)

    # All heads vectorized; e1/e2 share the segment index (rel), so both go
    # through a single (E, 2H) segment-softmax.  spmm is linear in alpha, so
    # summing alphas over heads before one scatter-add is exact.
    e1 = s_hh[h] + s_tt[t]                               # (E, H)
    e2 = s_ht[h] + s_th[t]                               # (E, H)
    alpha = segment_softmax(
        leaky_relu(jnp.concatenate([e1, e2], axis=1)), rel, num_rel)
    alpha1 = alpha[:, :num_heads].sum(axis=1)
    alpha2 = alpha[:, num_heads:].sum(axis=1)

    adj1 = jnp.zeros((num_rel, n), jnp.float32).at[rel, h].add(alpha1)
    adj2 = jnp.zeros((num_rel, n), jnp.float32).at[rel, t].add(alpha2)

    # Fused adj1 @ x_r_h + adj2 @ x_r_t with the 1/(2H) scale in the epilogue.
    x_r = pallas_dual_matmul(adj1, x_r_h, adj2, x_r_t,
                             scale=1.0 / (2.0 * num_heads))
    return x_r                                           # dropout: eval identity


def r2e_forward(p, x_e, x_r, edge_index, rel):
    h, t = edge_index[0], edge_index[1]
    n = x_e.shape[0]
    num_rel = x_r.shape[0]
    num_heads = p["a_h"].shape[0]

    # Fused entity-score projection: x_e @ [a_h^T | a_t^T] -> (N, 2H)
    s_e = pallas_matmul(x_e, jnp.concatenate([p["a_h"].T, p["a_t"].T], axis=1))
    s_h = s_e[:, :num_heads]
    s_t = s_e[:, num_heads:]
    s_r = pallas_matmul(x_r, p["a_r"].T)                 # (R, H)

    # All heads vectorized; two segment-softmaxes (different segment indices).
    e_h = s_h[h] + s_r[rel]                              # (E, H)
    e_t = s_t[t] + s_r[rel]                              # (E, H)
    alpha_h = segment_softmax(leaky_relu(e_h), h, n).sum(axis=1)
    alpha_t = segment_softmax(leaky_relu(e_t), t, n).sum(axis=1)

    adj_h = jnp.zeros((n, num_rel), jnp.float32).at[h, rel].add(alpha_h)
    adj_t = jnp.zeros((n, num_rel), jnp.float32).at[t, rel].add(alpha_t)

    # One row-stacked matmul replaces two (N,R)@(R,r_hidden) calls; scale fused.
    xet = pallas_matmul(jnp.concatenate([adj_h, adj_t], axis=0), x_r,
                        scale=1.0 / num_heads)           # (2N, r_hidden)
    return jnp.concatenate([xet[:n], xet[n:]], axis=1)   # dropout: eval identity


def gat_forward(p, x, edge_index_all):
    j, i = edge_index_all[0], edge_index_all[1]
    n = x.shape[0]
    num_heads = p["a_i"].shape[0]

    # Fused score projection: x @ [a_i^T | a_j^T] -> (N, 2H)
    s = pallas_matmul(x, jnp.concatenate([p["a_i"].T, p["a_j"].T], axis=1))
    s_i = s[:, :num_heads]
    s_j = s[:, num_heads:]

    e_ij = s_i[i] + s_j[j]                               # (E, H)
    alpha = segment_softmax(leaky_relu(e_ij), i, n).sum(axis=1)
    adj = jnp.zeros((n, n), jnp.float32).at[i, j].add(alpha)

    return pallas_matmul(adj, x, scale=1.0 / num_heads)  # dropout: eval identity


def interactive_gcn_forward(params, x_e, edge_index, rel, edge_index_all,
                            rel_all, *, num_rel, e2r_num_heads):
    del rel_all  # unused by the reference forward
    n = x_e.shape[0]
    adj_gcn = build_gcn_adj(edge_index_all, n)           # shared by both layers
    x_e = gcn_highway_forward(params["hw1"], adj_gcn, x_e)
    x_e = gcn_highway_forward(params["hw2"], adj_gcn, x_e)
    x_r = e2r_forward(params["e2r"], x_e, edge_index, rel, num_rel,
                      e2r_num_heads)
    x_e = jnp.concatenate(
        [x_e, r2e_forward(params["r2e"], x_e, x_r, edge_index, rel)], axis=1)
    x_e = jnp.concatenate(
        [x_e, gat_forward(params["gat"], x_e, edge_index_all)], axis=1)
    return x_e


# ----------------------------------------------------------------------------
# Deterministic parameter construction
# ----------------------------------------------------------------------------
def init_params(key, e_hidden, r_hidden, max_heads):
    def nrm(k, shape, scale=0.1):
        return scale * jax.random.normal(k, shape, jnp.float32)

    ks = jax.random.split(key, 16)
    gat_hidden = e_hidden + 2 * r_hidden
    return {
        "hw1": {"W": nrm(ks[0], (e_hidden, e_hidden)),
                "b": nrm(ks[1], (e_hidden,))},
        "hw2": {"W": nrm(ks[2], (e_hidden, e_hidden)),
                "b": nrm(ks[3], (e_hidden,))},
        "e2r": {"a_h": nrm(ks[4], (max_heads, r_hidden)),
                "a_t": nrm(ks[5], (max_heads, r_hidden)),
                "w_h": nrm(ks[6], (r_hidden, e_hidden)),
                "w_t": nrm(ks[7], (r_hidden, e_hidden)),
                "head_selector": jax.random.normal(ks[8], (max_heads,),
                                                   jnp.float32)},
        "r2e": {"a_h": nrm(ks[9], (max_heads, e_hidden)),
                "a_t": nrm(ks[10], (max_heads, e_hidden)),
                "a_r": nrm(ks[11], (max_heads, r_hidden))},
        "gat": {"a_i": nrm(ks[12], (max_heads, gat_hidden)),
                "a_j": nrm(ks[13], (max_heads, gat_hidden))},
    }


# ----------------------------------------------------------------------------
# Main
# ----------------------------------------------------------------------------
if __name__ == "__main__":
    key = jax.random.PRNGKey(0)
    N, E, NUM_REL = 16, 24, 5
    E_HIDDEN, R_HIDDEN, MAX_HEADS = 32, 16, 8

    kp, kx, kh, kt, kr, ks, kd = jax.random.split(key, 7)
    params = init_params(kp, E_HIDDEN, R_HIDDEN, MAX_HEADS)

    x_e = jax.random.normal(kx, (N, E_HIDDEN), jnp.float32)

    # KG triples (head, tail, relation)
    edge_h = jax.random.randint(kh, (E,), 0, N, jnp.int32)
    edge_t = jax.random.randint(kt, (E,), 0, N, jnp.int32)
    rel = jax.random.randint(kr, (E,), 0, NUM_REL, jnp.int32)
    rel = rel.at[0].set(NUM_REL - 1)  # ensure max relation id appears
    edge_index = jnp.stack([edge_h, edge_t], axis=0)

    # "all" graph: bidirectional random edges + self-loops (every node deg > 0)
    n_rand = 20
    src = jax.random.randint(ks, (n_rand,), 0, N, jnp.int32)
    dst = jax.random.randint(kd, (n_rand,), 0, N, jnp.int32)
    loops = jnp.arange(N, dtype=jnp.int32)
    ei_all_src = jnp.concatenate([src, dst, loops])
    ei_all_dst = jnp.concatenate([dst, src, loops])
    edge_index_all = jnp.stack([ei_all_src, ei_all_dst], axis=0)
    rel_all = jnp.zeros((ei_all_src.shape[0],), jnp.int32)  # unused by forward

    # Reference-semantics num_heads (softmax sums to ~1 -> 2), computed on the
    # host once so nothing inside the forward concretizes traced values.
    e2r_num_heads = min(
        int(float(jax.nn.softmax(params["e2r"]["head_selector"]).sum()) + 1.0),
        MAX_HEADS)
    e2r_num_heads = max(e2r_num_heads, 1)

    fwd = jax.jit(functools.partial(interactive_gcn_forward,
                                    num_rel=NUM_REL,
                                    e2r_num_heads=e2r_num_heads))
    out = fwd(params, x_e, edge_index, rel, edge_index_all, rel_all)
    out = jax.block_until_ready(out)

    expected_dim = 2 * (E_HIDDEN + 2 * R_HIDDEN)
    assert out.shape == (N, expected_dim), out.shape
    assert bool(jnp.all(jnp.isfinite(out)))
    print("KERNEL_OK")
</pallas_src>

<mosaic_0001>
module attributes {stable_mosaic.version = 11 : i64} {
  func.func @_gcn_highway_kernel(%arg0: i32, %arg1: i32, %arg2: memref<16x128xbf16, #tpu.memory_space<vmem>>, %arg3: memref<128x128xbf16, #tpu.memory_space<vmem>>, %arg4: memref<16x128xbf16, #tpu.memory_space<vmem>>, %arg5: memref<128x128xbf16, #tpu.memory_space<vmem>>, %arg6: memref<1x128xf32, #tpu.memory_space<vmem>>, %arg7: memref<16x128xf32, #tpu.memory_space<vmem>>, %arg8: memref<16x128xf32, #tpu.memory_space<vmem>>) attributes {dimension_semantics = [#tpu.dimension_semantics<parallel>, #tpu.dimension_semantics<arbitrary>], iteration_bounds = array<i64: 1, 1>, scalar_prefetch = 0 : i64, scratch_operands = 1 : i64, tpu.core_type = #tpu.core_type<tc>, window_params = [{transform_indices = @transform_0, window_bounds = array<i64: 16, 128>}, {transform_indices = @transform_1, window_bounds = array<i64: 128, 128>}, {transform_indices = @transform_2, window_bounds = array<i64: 16, 128>}, {pipeline_mode = #tpu.pipeline_mode<synchronous>, transform_indices = @transform_3, window_bounds = array<i64: 128, 128>}, {pipeline_mode = #tpu.pipeline_mode<synchronous>, transform_indices = @transform_4, window_bounds = array<i64: 1, 128>}, {transform_indices = @transform_5, window_bounds = array<i64: 16, 128>}]} {
    %c0_i32 = arith.constant 0 : i32
    %0 = arith.cmpi eq, %arg1, %c0_i32 : i32
    %1 = arith.extui %0 : i1 to i32
    %c0_i32_0 = arith.constant 0 : i32
    %2 = arith.cmpi ne, %1, %c0_i32_0 : i32
    scf.if %2 {
      %cst_10 = arith.constant 0.000000e+00 : f32
      %12 = vector.broadcast %cst_10 : f32 to vector<16x128xf32>
      %c0_11 = arith.constant 0 : index
      %c0_12 = arith.constant 0 : index
      %13 = vector.load %arg8[%c0_11, %c0_12] : memref<16x128xf32, #tpu.memory_space<vmem>>, vector<16x128xf32>
      tpu.vector_store %arg8[%c0_11, %c0_12], %12 {strides = array<i32>} : memref<16x128xf32, #tpu.memory_space<vmem>>, vector<16x128xf32>,
    } else {
    }
    %c0 = arith.constant 0 : index
    %c0_1 = arith.constant 0 : index
    %3 = vector.load %arg8[%c0, %c0_1] : memref<16x128xf32, #tpu.memory_space<vmem>>, vector<16x128xf32>
    %c0_2 = arith.constant 0 : index
    %c0_3 = arith.constant 0 : index
    %4 = vector.load %arg2[%c0_2, %c0_3] : memref<16x128xbf16, #tpu.memory_space<vmem>>, vector<16x128xbf16>
    %c0_4 = arith.constant 0 : index
    %c0_5 = arith.constant 0 : index
    %5 = vector.load %arg3[%c0_4, %c0_5] : memref<128x128xbf16, #tpu.memory_space<vmem>>, vector<128x128xbf16>
    %cst = arith.constant dense<0.000000e+00> : vector<16x128xf32>
    %6 = tpu.matmul %4, %5, %cst {dimension_numbers = #tpu.dot_dimension_numbers<[1], [0], [0], [1], [0, 0, 1, 1], [], []>} : vector<16x128xbf16>, vector<128x128xbf16>, vector<16x128xf32> -> vector<16x128xf32>
    %7 = arith.addf %3, %6 : vector<16x128xf32>
    %c0_6 = arith.constant 0 : index
    %c0_7 = arith.constant 0 : index
    %8 = vector.load %arg8[%c0_6, %c0_7] : memref<16x128xf32, #tpu.memory_space<vmem>>, vector<16x128xf32>
    tpu.vector_store %arg8[%c0_6, %c0_7], %7 {strides = array<i32>} : memref<16x128xf32, #tpu.memory_space<vmem>>, vector<16x128xf32>,
    %c0_i32_8 = arith.constant 0 : i32
    %9 = arith.cmpi eq, %arg1, %c0_i32_8 : i32
    %10 = arith.extui %9 : i1 to i32
    %c0_i32_9 = arith.constant 0 : i32
    %11 = arith.cmpi ne, %10, %c0_i32_9 : i32
    scf.if %11 {
      %c0_10 = arith.constant 0 : index
      %c0_11 = arith.constant 0 : index
      %12 = vector.load %arg8[%c0_10, %c0_11] : memref<16x128xf32, #tpu.memory_space<vmem>>, vector<16x128xf32>
      %cst_12 = arith.constant 0.000000e+00 : f32
      %13 = vector.broadcast %cst_12 : f32 to vector<16x128xf32>
      %14 = arith.maximumf %12, %13 : vector<16x128xf32>
      %c0_13 = arith.constant 0 : index
      %c0_14 = arith.constant 0 : index
      %15 = vector.load %arg4[%c0_13, %c0_14] : memref<16x128xbf16, #tpu.memory_space<vmem>>, vector<16x128xbf16>
      %16 = arith.extf %15 : vector<16x128xbf16> to vector<16x128xf32>
      %c0_15 = arith.constant 0 : index
      %c0_16 = arith.constant 0 : index
      %17 = vector.load %arg4[%c0_15, %c0_16] : memref<16x128xbf16, #tpu.memory_space<vmem>>, vector<16x128xbf16>
      %c0_17 = arith.constant 0 : index
      %c0_18 = arith.constant 0 : index
      %18 = vector.load %arg5[%c0_17, %c0_18] : memref<128x128xbf16, #tpu.memory_space<vmem>>, vector<128x128xbf16>
      %cst_19 = arith.constant dense<0.000000e+00> : vector<16x128xf32>
      %19 = tpu.matmul %17, %18, %cst_19 {dimension_numbers = #tpu.dot_dimension_numbers<[1], [0], [0], [1], [0, 0, 1, 1], [], []>} : vector<16x128xbf16>, vector<128x128xbf16>, vector<16x128xf32> -> vector<16x128xf32>
      %c0_20 = arith.constant 0 : index
      %c0_21 = arith.constant 0 : index
      %20 = vector.load %arg6[%c0_20, %c0_21] : memref<1x128xf32, #tpu.memory_space<vmem>>, vector<1x128xf32>
      %21 = vector.broadcast %20 : vector<1x128xf32> to vector<16x128xf32>
      %22 = arith.addf %19, %21 : vector<16x128xf32>
      %23 = arith.negf %22 : vector<16x128xf32>
      %24 = math.exp %23 : vector<16x128xf32>
      %cst_22 = arith.constant 1.000000e+00 : f32
      %25 = vector.broadcast %cst_22 : f32 to vector<16x128xf32>
      %26 = arith.addf %25, %24 : vector<16x128xf32>
      %27 = arith.divf %25, %26 : vector<16x128xf32>
      %28 = arith.mulf %27, %14 : vector<16x128xf32>
      %cst_23 = arith.constant 1.000000e+00 : f32
      %29 = vector.broadcast %cst_23 : f32 to vector<16x128xf32>
      %30 = arith.subf %29, %27 : vector<16x128xf32>
      %31 = arith.mulf %30, %16 : vector<16x128xf32>
      %32 = arith.addf %28, %31 : vector<16x128xf32>
      %c0_24 = arith.constant 0 : index
      %c0_25 = arith.constant 0 : index
      %33 = vector.load %arg7[%c0_24, %c0_25] : memref<16x128xf32, #tpu.memory_space<vmem>>, vector<16x128xf32>
      tpu.vector_store %arg7[%c0_24, %c0_25], %32 {strides = array<i32>} : memref<16x128xf32, #tpu.memory_space<vmem>>, vector<16x128xf32>,
    } else {
    }
    return
  }
  func.func @transform_0(%arg0: i32, %arg1: i32) -> (i32, i32) {
    %c0_i32 = arith.constant 0 : i32
    return %arg0, %arg1 : i32, i32
  }
  func.func @transform_1(%arg0: i32, %arg1: i32) -> (i32, i32) {
    %c0_i32 = arith.constant 0 : i32
    %c0_i32_0 = arith.constant 0 : i32
    return %arg1, %c0_i32 : i32, i32
  }
  func.func @transform_2(%arg0: i32, %arg1: i32) -> (i32, i32) {
    %c0_i32 = arith.constant 0 : i32
    %c0_i32_0 = arith.constant 0 : i32
    return %arg0, %c0_i32 : i32, i32
  }
  func.func @transform_3(%arg0: i32, %arg1: i32) -> (i32, i32) {
    %c0_i32 = arith.constant 0 : i32
    %c0_i32_0 = arith.constant 0 : i32
    %c0_i32_1 = arith.constant 0 : i32
    return %c0_i32, %c0_i32_0 : i32, i32
  }
  func.func @transform_4(%arg0: i32, %arg1: i32) -> (i32, i32) {
    %c0_i32 = arith.constant 0 : i32
    %c0_i32_0 = arith.constant 0 : i32
    %c0_i32_1 = arith.constant 0 : i32
    return %c0_i32, %c0_i32_0 : i32, i32
  }
  func.func @transform_5(%arg0: i32, %arg1: i32) -> (i32, i32) {
    %c0_i32 = arith.constant 0 : i32
    %c0_i32_0 = arith.constant 0 : i32
    return %arg0, %c0_i32 : i32, i32
  }
}

module attributes {stable_mosaic.version = 11 : i64} {
  func.func @_mm_kernel(%arg0: i32, %arg1: i32, %arg2: i32, %arg3: memref<16x128xbf16, #tpu.memory_space<vmem>>, %arg4: memref<128x128xbf16, #tpu.memory_space<vmem>>, %arg5: memref<16x128xf32, #tpu.memory_space<vmem>>, %arg6: memref<16x128xf32, #tpu.memory_space<vmem>>) attributes {dimension_semantics = [#tpu.dimension_semantics<parallel>, #tpu.dimension_semantics<parallel>, #tpu.dimension_semantics<arbitrary>], iteration_bounds = array<i64: 1, 1, 1>, scalar_prefetch = 0 : i64, scratch_operands = 1 : i64, tpu.core_type = #tpu.core_type<tc>, window_params = [{transform_indices = @transform_0, window_bounds = array<i64: 16, 128>}, {transform_indices = @transform_1, window_bounds = array<i64: 128, 128>}, {transform_indices = @transform_2, window_bounds = array<i64: 16, 128>}]} {
    %c0_i32 = arith.constant 0 : i32
    %0 = arith.cmpi eq, %arg2, %c0_i32 : i32
    %1 = arith.extui %0 : i1 to i32
    %c0_i32_0 = arith.constant 0 : i32
    %2 = arith.cmpi ne, %1, %c0_i32_0 : i32
    scf.if %2 {
      %cst_10 = arith.constant 0.000000e+00 : f32
      %12 = vector.broadcast %cst_10 : f32 to vector<16x128xf32>
      %c0_11 = arith.constant 0 : index
      %c0_12 = arith.constant 0 : index
      %13 = vector.load %arg6[%c0_11, %c0_12] : memref<16x128xf32, #tpu.memory_space<vmem>>, vector<16x128xf32>
      tpu.vector_store %arg6[%c0_11, %c0_12], %12 {strides = array<i32>} : memref<16x128xf32, #tpu.memory_space<vmem>>, vector<16x128xf32>,
    } else {
    }
    %c0 = arith.constant 0 : index
    %c0_1 = arith.constant 0 : index
    %3 = vector.load %arg6[%c0, %c0_1] : memref<16x128xf32, #tpu.memory_space<vmem>>, vector<16x128xf32>
    %c0_2 = arith.constant 0 : index
    %c0_3 = arith.constant 0 : index
    %4 = vector.load %arg3[%c0_2, %c0_3] : memref<16x128xbf16, #tpu.memory_space<vmem>>, vector<16x128xbf16>
    %c0_4 = arith.constant 0 : index
    %c0_5 = arith.constant 0 : index
    %5 = vector.load %arg4[%c0_4, %c0_5] : memref<128x128xbf16, #tpu.memory_space<vmem>>, vector<128x128xbf16>
    %cst = arith.constant dense<0.000000e+00> : vector<16x128xf32>
    %6 = tpu.matmul %4, %5, %cst {dimension_numbers = #tpu.dot_dimension_numbers<[1], [0], [0], [1], [0, 0, 1, 1], [], []>} : vector<16x128xbf16>, vector<128x128xbf16>, vector<16x128xf32> -> vector<16x128xf32>
    %7 = arith.addf %3, %6 : vector<16x128xf32>
    %c0_6 = arith.constant 0 : index
    %c0_7 = arith.constant 0 : index
    %8 = vector.load %arg6[%c0_6, %c0_7] : memref<16x128xf32, #tpu.memory_space<vmem>>, vector<16x128xf32>
    tpu.vector_store %arg6[%c0_6, %c0_7], %7 {strides = array<i32>} : memref<16x128xf32, #tpu.memory_space<vmem>>, vector<16x128xf32>,
    %c0_i32_8 = arith.constant 0 : i32
    %9 = arith.cmpi eq, %arg2, %c0_i32_8 : i32
    %10 = arith.extui %9 : i1 to i32
    %c0_i32_9 = arith.constant 0 : i32
    %11 = arith.cmpi ne, %10, %c0_i32_9 : i32
    scf.if %11 {
      %c0_10 = arith.constant 0 : index
      %c0_11 = arith.constant 0 : index
      %12 = vector.load %arg6[%c0_10, %c0_11] : memref<16x128xf32, #tpu.memory_space<vmem>>, vector<16x128xf32>
      %c0_12 = arith.constant 0 : index
      %c0_13 = arith.constant 0 : index
      %13 = vector.load %arg5[%c0_12, %c0_13] : memref<16x128xf32, #tpu.memory_space<vmem>>, vector<16x128xf32>
      tpu.vector_store %arg5[%c0_12, %c0_13], %12 {strides = array<i32>} : memref<16x128xf32, #tpu.memory_space<vmem>>, vector<16x128xf32>,
    } else {
    }
    return
  }
  func.func @transform_0(%arg0: i32, %arg1: i32, %arg2: i32) -> (i32, i32) {
    %c0_i32 = arith.constant 0 : i32
    return %arg0, %arg2 : i32, i32
  }
  func.func @transform_1(%arg0: i32, %arg1: i32, %arg2: i32) -> (i32, i32) {
    %c0_i32 = arith.constant 0 : i32
    return %arg2, %arg1 : i32, i32
  }
  func.func @transform_2(%arg0: i32, %arg1: i32, %arg2: i32) -> (i32, i32) {
    %c0_i32 = arith.constant 0 : i32
    return %arg0, %arg1 : i32, i32
  }
}

module attributes {stable_mosaic.version = 11 : i64} {
  func.func @_mm_kernel(%arg0: i32, %arg1: i32, %arg2: i32, %arg3: memref<32x128xbf16, #tpu.memory_space<vmem>>, %arg4: memref<128x128xbf16, #tpu.memory_space<vmem>>, %arg5: memref<32x128xf32, #tpu.memory_space<vmem>>, %arg6: memref<32x128xf32, #tpu.memory_space<vmem>>) attributes {dimension_semantics = [#tpu.dimension_semantics<parallel>, #tpu.dimension_semantics<parallel>, #tpu.dimension_semantics<arbitrary>], iteration_bounds = array<i64: 1, 1, 1>, scalar_prefetch = 0 : i64, scratch_operands = 1 : i64, tpu.core_type = #tpu.core_type<tc>, window_params = [{transform_indices = @transform_0, window_bounds = array<i64: 32, 128>}, {transform_indices = @transform_1, window_bounds = array<i64: 128, 128>}, {transform_indices = @transform_2, window_bounds = array<i64: 32, 128>}]} {
    %c0_i32 = arith.constant 0 : i32
    %0 = arith.cmpi eq, %arg2, %c0_i32 : i32
    %1 = arith.extui %0 : i1 to i32
    %c0_i32_0 = arith.constant 0 : i32
    %2 = arith.cmpi ne, %1, %c0_i32_0 : i32
    scf.if %2 {
      %cst_10 = arith.constant 0.000000e+00 : f32
      %12 = vector.broadcast %cst_10 : f32 to vector<32x128xf32>
      %c0_11 = arith.constant 0 : index
      %c0_12 = arith.constant 0 : index
      %13 = vector.load %arg6[%c0_11, %c0_12] : memref<32x128xf32, #tpu.memory_space<vmem>>, vector<32x128xf32>
      tpu.vector_store %arg6[%c0_11, %c0_12], %12 {strides = array<i32>} : memref<32x128xf32, #tpu.memory_space<vmem>>, vector<32x128xf32>,
    } else {
    }
    %c0 = arith.constant 0 : index
    %c0_1 = arith.constant 0 : index
    %3 = vector.load %arg6[%c0, %c0_1] : memref<32x128xf32, #tpu.memory_space<vmem>>, vector<32x128xf32>
    %c0_2 = arith.constant 0 : index
    %c0_3 = arith.constant 0 : index
    %4 = vector.load %arg3[%c0_2, %c0_3] : memref<32x128xbf16, #tpu.memory_space<vmem>>, vector<32x128xbf16>
    %c0_4 = arith.constant 0 : index
    %c0_5 = arith.constant 0 : index
    %5 = vector.load %arg4[%c0_4, %c0_5] : memref<128x128xbf16, #tpu.memory_space<vmem>>, vector<128x128xbf16>
    %cst = arith.constant dense<0.000000e+00> : vector<32x128xf32>
    %6 = tpu.matmul %4, %5, %cst {dimension_numbers = #tpu.dot_dimension_numbers<[1], [0], [0], [1], [0, 0, 1, 1], [], []>} : vector<32x128xbf16>, vector<128x128xbf16>, vector<32x128xf32> -> vector<32x128xf32>
    %7 = arith.addf %3, %6 : vector<32x128xf32>
    %c0_6 = arith.constant 0 : index
    %c0_7 = arith.constant 0 : index
    %8 = vector.load %arg6[%c0_6, %c0_7] : memref<32x128xf32, #tpu.memory_space<vmem>>, vector<32x128xf32>
    tpu.vector_store %arg6[%c0_6, %c0_7], %7 {strides = array<i32>} : memref<32x128xf32, #tpu.memory_space<vmem>>, vector<32x128xf32>,
    %c0_i32_8 = arith.constant 0 : i32
    %9 = arith.cmpi eq, %arg2, %c0_i32_8 : i32
    %10 = arith.extui %9 : i1 to i32
    %c0_i32_9 = arith.constant 0 : i32
    %11 = arith.cmpi ne, %10, %c0_i32_9 : i32
    scf.if %11 {
      %c0_10 = arith.constant 0 : index
      %c0_11 = arith.constant 0 : index
      %12 = vector.load %arg6[%c0_10, %c0_11] : memref<32x128xf32, #tpu.memory_space<vmem>>, vector<32x128xf32>
      %c0_12 = arith.constant 0 : index
      %c0_13 = arith.constant 0 : index
      %13 = vector.load %arg5[%c0_12, %c0_13] : memref<32x128xf32, #tpu.memory_space<vmem>>, vector<32x128xf32>
      tpu.vector_store %arg5[%c0_12, %c0_13], %12 {strides = array<i32>} : memref<32x128xf32, #tpu.memory_space<vmem>>, vector<32x128xf32>,
    } else {
    }
    return
  }
  func.func @transform_0(%arg0: i32, %arg1: i32, %arg2: i32) -> (i32, i32) {
    %c0_i32 = arith.constant 0 : i32
    return %arg0, %arg2 : i32, i32
  }
  func.func @transform_1(%arg0: i32, %arg1: i32, %arg2: i32) -> (i32, i32) {
    %c0_i32 = arith.constant 0 : i32
    return %arg2, %arg1 : i32, i32
  }
  func.func @transform_2(%arg0: i32, %arg1: i32, %arg2: i32) -> (i32, i32) {
    %c0_i32 = arith.constant 0 : i32
    return %arg0, %arg1 : i32, i32
  }
}

module attributes {stable_mosaic.version = 11 : i64} {
  func.func @_dual_mm_kernel(%arg0: i32, %arg1: i32, %arg2: i32, %arg3: memref<8x128xbf16, #tpu.memory_space<vmem>>, %arg4: memref<128x128xbf16, #tpu.memory_space<vmem>>, %arg5: memref<8x128xbf16, #tpu.memory_space<vmem>>, %arg6: memref<128x128xbf16, #tpu.memory_space<vmem>>, %arg7: memref<8x128xf32, #tpu.memory_space<vmem>>, %arg8: memref<8x128xf32, #tpu.memory_space<vmem>>) attributes {dimension_semantics = [#tpu.dimension_semantics<parallel>, #tpu.dimension_semantics<parallel>, #tpu.dimension_semantics<arbitrary>], iteration_bounds = array<i64: 1, 1, 1>, scalar_prefetch = 0 : i64, scratch_operands = 1 : i64, tpu.core_type = #tpu.core_type<tc>, window_params = [{transform_indices = @transform_0, window_bounds = array<i64: 8, 128>}, {transform_indices = @transform_1, window_bounds = array<i64: 128, 128>}, {transform_indices = @transform_2, window_bounds = array<i64: 8, 128>}, {transform_indices = @transform_3, window_bounds = array<i64: 128, 128>}, {transform_indices = @transform_4, window_bounds = array<i64: 8, 128>}]} {
    %c0_i32 = arith.constant 0 : i32
    %0 = arith.cmpi eq, %arg2, %c0_i32 : i32
    %1 = arith.extui %0 : i1 to i32
    %c0_i32_0 = arith.constant 0 : i32
    %2 = arith.cmpi ne, %1, %c0_i32_0 : i32
    scf.if %2 {
      %cst_19 = arith.constant 0.000000e+00 : f32
      %18 = vector.broadcast %cst_19 : f32 to vector<8x128xf32>
      %c0_20 = arith.constant 0 : index
      %c0_21 = arith.constant 0 : index
      %19 = vector.load %arg8[%c0_20, %c0_21] : memref<8x128xf32, #tpu.memory_space<vmem>>, vector<8x128xf32>
      tpu.vector_store %arg8[%c0_20, %c0_21], %18 {strides = array<i32>} : memref<8x128xf32, #tpu.memory_space<vmem>>, vector<8x128xf32>,
    } else {
    }
    %c0 = arith.constant 0 : index
    %c0_1 = arith.constant 0 : index
    %3 = vector.load %arg8[%c0, %c0_1] : memref<8x128xf32, #tpu.memory_space<vmem>>, vector<8x128xf32>
    %c0_2 = arith.constant 0 : index
    %c0_3 = arith.constant 0 : index
    %4 = vector.load %arg3[%c0_2, %c0_3] : memref<8x128xbf16, #tpu.memory_space<vmem>>, vector<8x128xbf16>
    %c0_4 = arith.constant 0 : index
    %c0_5 = arith.constant 0 : index
    %5 = vector.load %arg4[%c0_4, %c0_5] : memref<128x128xbf16, #tpu.memory_space<vmem>>, vector<128x128xbf16>
    %cst = arith.constant dense<0.000000e+00> : vector<8x128xf32>
    %6 = tpu.matmul %4, %5, %cst {dimension_numbers = #tpu.dot_dimension_numbers<[1], [0], [0], [1], [0, 0, 1, 1], [], []>} : vector<8x128xbf16>, vector<128x128xbf16>, vector<8x128xf32> -> vector<8x128xf32>
    %7 = arith.addf %3, %6 : vector<8x128xf32>
    %c0_6 = arith.constant 0 : index
    %c0_7 = arith.constant 0 : index
    %8 = vector.load %arg8[%c0_6, %c0_7] : memref<8x128xf32, #tpu.memory_space<vmem>>, vector<8x128xf32>
    tpu.vector_store %arg8[%c0_6, %c0_7], %7 {strides = array<i32>} : memref<8x128xf32, #tpu.memory_space<vmem>>, vector<8x128xf32>,
    %c0_8 = arith.constant 0 : index
    %c0_9 = arith.constant 0 : index
    %9 = vector.load %arg8[%c0_8, %c0_9] : memref<8x128xf32, #tpu.memory_space<vmem>>, vector<8x128xf32>
    %c0_10 = arith.constant 0 : index
    %c0_11 = arith.constant 0 : index
    %10 = vector.load %arg5[%c0_10, %c0_11] : memref<8x128xbf16, #tpu.memory_space<vmem>>, vector<8x128xbf16>
    %c0_12 = arith.constant 0 : index
    %c0_13 = arith.constant 0 : index
    %11 = vector.load %arg6[%c0_12, %c0_13] : memref<128x128xbf16, #tpu.memory_space<vmem>>, vector<128x128xbf16>
    %cst_14 = arith.constant dense<0.000000e+00> : vector<8x128xf32>
    %12 = tpu.matmul %10, %11, %cst_14 {dimension_numbers = #tpu.dot_dimension_numbers<[1], [0], [0], [1], [0, 0, 1, 1], [], []>} : vector<8x128xbf16>, vector<128x128xbf16>, vector<8x128xf32> -> vector<8x128xf32>
    %13 = arith.addf %9, %12 : vector<8x128xf32>
    %c0_15 = arith.constant 0 : index
    %c0_16 = arith.constant 0 : index
    %14 = vector.load %arg8[%c0_15, %c0_16] : memref<8x128xf32, #tpu.memory_space<vmem>>, vector<8x128xf32>
    tpu.vector_store %arg8[%c0_15, %c0_16], %13 {strides = array<i32>} : memref<8x128xf32, #tpu.memory_space<vmem>>, vector<8x128xf32>,
    %c0_i32_17 = arith.constant 0 : i32
    %15 = arith.cmpi eq, %arg2, %c0_i32_17 : i32
    %16 = arith.extui %15 : i1 to i32
    %c0_i32_18 = arith.constant 0 : i32
    %17 = arith.cmpi ne, %16, %c0_i32_18 : i32
    scf.if %17 {
      %c0_19 = arith.constant 0 : index
      %c0_20 = arith.constant 0 : index
      %18 = vector.load %arg8[%c0_19, %c0_20] : memref<8x128xf32, #tpu.memory_space<vmem>>, vector<8x128xf32>
      %cst_21 = arith.constant 2.500000e-01 : f32
      %19 = vector.broadcast %cst_21 : f32 to vector<8x128xf32>
      %20 = arith.mulf %18, %19 : vector<8x128xf32>
      %c0_22 = arith.constant 0 : index
      %c0_23 = arith.constant 0 : index
      %21 = vector.load %arg7[%c0_22, %c0_23] : memref<8x128xf32, #tpu.memory_space<vmem>>, vector<8x128xf32>
      tpu.vector_store %arg7[%c0_22, %c0_23], %20 {strides = array<i32>} : memref<8x128xf32, #tpu.memory_space<vmem>>, vector<8x128xf32>,
    } else {
    }
    return
  }
  func.func @transform_0(%arg0: i32, %arg1: i32, %arg2: i32) -> (i32, i32) {
    %c0_i32 = arith.constant 0 : i32
    return %arg0, %arg2 : i32, i32
  }
  func.func @transform_1(%arg0: i32, %arg1: i32, %arg2: i32) -> (i32, i32) {
    %c0_i32 = arith.constant 0 : i32
    return %arg2, %arg1 : i32, i32
  }
  func.func @transform_2(%arg0: i32, %arg1: i32, %arg2: i32) -> (i32, i32) {
    %c0_i32 = arith.constant 0 : i32
    return %arg0, %arg2 : i32, i32
  }
  func.func @transform_3(%arg0: i32, %arg1: i32, %arg2: i32) -> (i32, i32) {
    %c0_i32 = arith.constant 0 : i32
    return %arg2, %arg1 : i32, i32
  }
  func.func @transform_4(%arg0: i32, %arg1: i32, %arg2: i32) -> (i32, i32) {
    %c0_i32 = arith.constant 0 : i32
    return %arg0, %arg1 : i32, i32
  }
}

module attributes {stable_mosaic.version = 11 : i64} {
  func.func @_mm_kernel(%arg0: i32, %arg1: i32, %arg2: i32, %arg3: memref<8x128xbf16, #tpu.memory_space<vmem>>, %arg4: memref<128x128xbf16, #tpu.memory_space<vmem>>, %arg5: memref<8x128xf32, #tpu.memory_space<vmem>>, %arg6: memref<8x128xf32, #tpu.memory_space<vmem>>) attributes {dimension_semantics = [#tpu.dimension_semantics<parallel>, #tpu.dimension_semantics<parallel>, #tpu.dimension_semantics<arbitrary>], iteration_bounds = array<i64: 1, 1, 1>, scalar_prefetch = 0 : i64, scratch_operands = 1 : i64, tpu.core_type = #tpu.core_type<tc>, window_params = [{transform_indices = @transform_0, window_bounds = array<i64: 8, 128>}, {transform_indices = @transform_1, window_bounds = array<i64: 128, 128>}, {transform_indices = @transform_2, window_bounds = array<i64: 8, 128>}]} {
    %c0_i32 = arith.constant 0 : i32
    %0 = arith.cmpi eq, %arg2, %c0_i32 : i32
    %1 = arith.extui %0 : i1 to i32
    %c0_i32_0 = arith.constant 0 : i32
    %2 = arith.cmpi ne, %1, %c0_i32_0 : i32
    scf.if %2 {
      %cst_10 = arith.constant 0.000000e+00 : f32
      %12 = vector.broadcast %cst_10 : f32 to vector<8x128xf32>
      %c0_11 = arith.constant 0 : index
      %c0_12 = arith.constant 0 : index
      %13 = vector.load %arg6[%c0_11, %c0_12] : memref<8x128xf32, #tpu.memory_space<vmem>>, vector<8x128xf32>
      tpu.vector_store %arg6[%c0_11, %c0_12], %12 {strides = array<i32>} : memref<8x128xf32, #tpu.memory_space<vmem>>, vector<8x128xf32>,
    } else {
    }
    %c0 = arith.constant 0 : index
    %c0_1 = arith.constant 0 : index
    %3 = vector.load %arg6[%c0, %c0_1] : memref<8x128xf32, #tpu.memory_space<vmem>>, vector<8x128xf32>
    %c0_2 = arith.constant 0 : index
    %c0_3 = arith.constant 0 : index
    %4 = vector.load %arg3[%c0_2, %c0_3] : memref<8x128xbf16, #tpu.memory_space<vmem>>, vector<8x128xbf16>
    %c0_4 = arith.constant 0 : index
    %c0_5 = arith.constant 0 : index
    %5 = vector.load %arg4[%c0_4, %c0_5] : memref<128x128xbf16, #tpu.memory_space<vmem>>, vector<128x128xbf16>
    %cst = arith.constant dense<0.000000e+00> : vector<8x128xf32>
    %6 = tpu.matmul %4, %5, %cst {dimension_numbers = #tpu.dot_dimension_numbers<[1], [0], [0], [1], [0, 0, 1, 1], [], []>} : vector<8x128xbf16>, vector<128x128xbf16>, vector<8x128xf32> -> vector<8x128xf32>
    %7 = arith.addf %3, %6 : vector<8x128xf32>
    %c0_6 = arith.constant 0 : index
    %c0_7 = arith.constant 0 : index
    %8 = vector.load %arg6[%c0_6, %c0_7] : memref<8x128xf32, #tpu.memory_space<vmem>>, vector<8x128xf32>
    tpu.vector_store %arg6[%c0_6, %c0_7], %7 {strides = array<i32>} : memref<8x128xf32, #tpu.memory_space<vmem>>, vector<8x128xf32>,
    %c0_i32_8 = arith.constant 0 : i32
    %9 = arith.cmpi eq, %arg2, %c0_i32_8 : i32
    %10 = arith.extui %9 : i1 to i32
    %c0_i32_9 = arith.constant 0 : i32
    %11 = arith.cmpi ne, %10, %c0_i32_9 : i32
    scf.if %11 {
      %c0_10 = arith.constant 0 : index
      %c0_11 = arith.constant 0 : index
      %12 = vector.load %arg6[%c0_10, %c0_11] : memref<8x128xf32, #tpu.memory_space<vmem>>, vector<8x128xf32>
      %c0_12 = arith.constant 0 : index
      %c0_13 = arith.constant 0 : index
      %13 = vector.load %arg5[%c0_12, %c0_13] : memref<8x128xf32, #tpu.memory_space<vmem>>, vector<8x128xf32>
      tpu.vector_store %arg5[%c0_12, %c0_13], %12 {strides = array<i32>} : memref<8x128xf32, #tpu.memory_space<vmem>>, vector<8x128xf32>,
    } else {
    }
    return
  }
  func.func @transform_0(%arg0: i32, %arg1: i32, %arg2: i32) -> (i32, i32) {
    %c0_i32 = arith.constant 0 : i32
    return %arg0, %arg2 : i32, i32
  }
  func.func @transform_1(%arg0: i32, %arg1: i32, %arg2: i32) -> (i32, i32) {
    %c0_i32 = arith.constant 0 : i32
    return %arg2, %arg1 : i32, i32
  }
  func.func @transform_2(%arg0: i32, %arg1: i32, %arg2: i32) -> (i32, i32) {
    %c0_i32 = arith.constant 0 : i32
    return %arg0, %arg1 : i32, i32
  }
}

module attributes {stable_mosaic.version = 11 : i64} {
  func.func @_mm_kernel(%arg0: i32, %arg1: i32, %arg2: i32, %arg3: memref<32x128xbf16, #tpu.memory_space<vmem>>, %arg4: memref<128x128xbf16, #tpu.memory_space<vmem>>, %arg5: memref<32x128xf32, #tpu.memory_space<vmem>>, %arg6: memref<32x128xf32, #tpu.memory_space<vmem>>) attributes {dimension_semantics = [#tpu.dimension_semantics<parallel>, #tpu.dimension_semantics<parallel>, #tpu.dimension_semantics<arbitrary>], iteration_bounds = array<i64: 1, 1, 1>, scalar_prefetch = 0 : i64, scratch_operands = 1 : i64, tpu.core_type = #tpu.core_type<tc>, window_params = [{transform_indices = @transform_0, window_bounds = array<i64: 32, 128>}, {transform_indices = @transform_1, window_bounds = array<i64: 128, 128>}, {transform_indices = @transform_2, window_bounds = array<i64: 32, 128>}]} {
    %c0_i32 = arith.constant 0 : i32
    %0 = arith.cmpi eq, %arg2, %c0_i32 : i32
    %1 = arith.extui %0 : i1 to i32
    %c0_i32_0 = arith.constant 0 : i32
    %2 = arith.cmpi ne, %1, %c0_i32_0 : i32
    scf.if %2 {
      %cst_10 = arith.constant 0.000000e+00 : f32
      %12 = vector.broadcast %cst_10 : f32 to vector<32x128xf32>
      %c0_11 = arith.constant 0 : index
      %c0_12 = arith.constant 0 : index
      %13 = vector.load %arg6[%c0_11, %c0_12] : memref<32x128xf32, #tpu.memory_space<vmem>>, vector<32x128xf32>
      tpu.vector_store %arg6[%c0_11, %c0_12], %12 {strides = array<i32>} : memref<32x128xf32, #tpu.memory_space<vmem>>, vector<32x128xf32>,
    } else {
    }
    %c0 = arith.constant 0 : index
    %c0_1 = arith.constant 0 : index
    %3 = vector.load %arg6[%c0, %c0_1] : memref<32x128xf32, #tpu.memory_space<vmem>>, vector<32x128xf32>
    %c0_2 = arith.constant 0 : index
    %c0_3 = arith.constant 0 : index
    %4 = vector.load %arg3[%c0_2, %c0_3] : memref<32x128xbf16, #tpu.memory_space<vmem>>, vector<32x128xbf16>
    %c0_4 = arith.constant 0 : index
    %c0_5 = arith.constant 0 : index
    %5 = vector.load %arg4[%c0_4, %c0_5] : memref<128x128xbf16, #tpu.memory_space<vmem>>, vector<128x128xbf16>
    %cst = arith.constant dense<0.000000e+00> : vector<32x128xf32>
    %6 = tpu.matmul %4, %5, %cst {dimension_numbers = #tpu.dot_dimension_numbers<[1], [0], [0], [1], [0, 0, 1, 1], [], []>} : vector<32x128xbf16>, vector<128x128xbf16>, vector<32x128xf32> -> vector<32x128xf32>
    %7 = arith.addf %3, %6 : vector<32x128xf32>
    %c0_6 = arith.constant 0 : index
    %c0_7 = arith.constant 0 : index
    %8 = vector.load %arg6[%c0_6, %c0_7] : memref<32x128xf32, #tpu.memory_space<vmem>>, vector<32x128xf32>
    tpu.vector_store %arg6[%c0_6, %c0_7], %7 {strides = array<i32>} : memref<32x128xf32, #tpu.memory_space<vmem>>, vector<32x128xf32>,
    %c0_i32_8 = arith.constant 0 : i32
    %9 = arith.cmpi eq, %arg2, %c0_i32_8 : i32
    %10 = arith.extui %9 : i1 to i32
    %c0_i32_9 = arith.constant 0 : i32
    %11 = arith.cmpi ne, %10, %c0_i32_9 : i32
    scf.if %11 {
      %c0_10 = arith.constant 0 : index
      %c0_11 = arith.constant 0 : index
      %12 = vector.load %arg6[%c0_10, %c0_11] : memref<32x128xf32, #tpu.memory_space<vmem>>, vector<32x128xf32>
      %cst_12 = arith.constant 1.250000e-01 : f32
      %13 = vector.broadcast %cst_12 : f32 to vector<32x128xf32>
      %14 = arith.mulf %12, %13 : vector<32x128xf32>
      %c0_13 = arith.constant 0 : index
      %c0_14 = arith.constant 0 : index
      %15 = vector.load %arg5[%c0_13, %c0_14] : memref<32x128xf32, #tpu.memory_space<vmem>>, vector<32x128xf32>
      tpu.vector_store %arg5[%c0_13, %c0_14], %14 {strides = array<i32>} : memref<32x128xf32, #tpu.memory_space<vmem>>, vector<32x128xf32>,
    } else {
    }
    return
  }
  func.func @transform_0(%arg0: i32, %arg1: i32, %arg2: i32) -> (i32, i32) {
    %c0_i32 = arith.constant 0 : i32
    return %arg0, %arg2 : i32, i32
  }
  func.func @transform_1(%arg0: i32, %arg1: i32, %arg2: i32) -> (i32, i32) {
    %c0_i32 = arith.constant 0 : i32
    return %arg2, %arg1 : i32, i32
  }
  func.func @transform_2(%arg0: i32, %arg1: i32, %arg2: i32) -> (i32, i32) {
    %c0_i32 = arith.constant 0 : i32
    return %arg0, %arg1 : i32, i32
  }
}

module attributes {stable_mosaic.version = 11 : i64} {
  func.func @_mm_kernel(%arg0: i32, %arg1: i32, %arg2: i32, %arg3: memref<16x128xbf16, #tpu.memory_space<vmem>>, %arg4: memref<128x128xbf16, #tpu.memory_space<vmem>>, %arg5: memref<16x128xf32, #tpu.memory_space<vmem>>, %arg6: memref<16x128xf32, #tpu.memory_space<vmem>>) attributes {dimension_semantics = [#tpu.dimension_semantics<parallel>, #tpu.dimension_semantics<parallel>, #tpu.dimension_semantics<arbitrary>], iteration_bounds = array<i64: 1, 1, 1>, scalar_prefetch = 0 : i64, scratch_operands = 1 : i64, tpu.core_type = #tpu.core_type<tc>, window_params = [{transform_indices = @transform_0, window_bounds = array<i64: 16, 128>}, {transform_indices = @transform_1, window_bounds = array<i64: 128, 128>}, {transform_indices = @transform_2, window_bounds = array<i64: 16, 128>}]} {
    %c0_i32 = arith.constant 0 : i32
    %0 = arith.cmpi eq, %arg2, %c0_i32 : i32
    %1 = arith.extui %0 : i1 to i32
    %c0_i32_0 = arith.constant 0 : i32
    %2 = arith.cmpi ne, %1, %c0_i32_0 : i32
    scf.if %2 {
      %cst_10 = arith.constant 0.000000e+00 : f32
      %12 = vector.broadcast %cst_10 : f32 to vector<16x128xf32>
      %c0_11 = arith.constant 0 : index
      %c0_12 = arith.constant 0 : index
      %13 = vector.load %arg6[%c0_11, %c0_12] : memref<16x128xf32, #tpu.memory_space<vmem>>, vector<16x128xf32>
      tpu.vector_store %arg6[%c0_11, %c0_12], %12 {strides = array<i32>} : memref<16x128xf32, #tpu.memory_space<vmem>>, vector<16x128xf32>,
    } else {
    }
    %c0 = arith.constant 0 : index
    %c0_1 = arith.constant 0 : index
    %3 = vector.load %arg6[%c0, %c0_1] : memref<16x128xf32, #tpu.memory_space<vmem>>, vector<16x128xf32>
    %c0_2 = arith.constant 0 : index
    %c0_3 = arith.constant 0 : index
    %4 = vector.load %arg3[%c0_2, %c0_3] : memref<16x128xbf16, #tpu.memory_space<vmem>>, vector<16x128xbf16>
    %c0_4 = arith.constant 0 : index
    %c0_5 = arith.constant 0 : index
    %5 = vector.load %arg4[%c0_4, %c0_5] : memref<128x128xbf16, #tpu.memory_space<vmem>>, vector<128x128xbf16>
    %cst = arith.constant dense<0.000000e+00> : vector<16x128xf32>
    %6 = tpu.matmul %4, %5, %cst {dimension_numbers = #tpu.dot_dimension_numbers<[1], [0], [0], [1], [0, 0, 1, 1], [], []>} : vector<16x128xbf16>, vector<128x128xbf16>, vector<16x128xf32> -> vector<16x128xf32>
    %7 = arith.addf %3, %6 : vector<16x128xf32>
    %c0_6 = arith.constant 0 : index
    %c0_7 = arith.constant 0 : index
    %8 = vector.load %arg6[%c0_6, %c0_7] : memref<16x128xf32, #tpu.memory_space<vmem>>, vector<16x128xf32>
    tpu.vector_store %arg6[%c0_6, %c0_7], %7 {strides = array<i32>} : memref<16x128xf32, #tpu.memory_space<vmem>>, vector<16x128xf32>,
    %c0_i32_8 = arith.constant 0 : i32
    %9 = arith.cmpi eq, %arg2, %c0_i32_8 : i32
    %10 = arith.extui %9 : i1 to i32
    %c0_i32_9 = arith.constant 0 : i32
    %11 = arith.cmpi ne, %10, %c0_i32_9 : i32
    scf.if %11 {
      %c0_10 = arith.constant 0 : index
      %c0_11 = arith.constant 0 : index
      %12 = vector.load %arg6[%c0_10, %c0_11] : memref<16x128xf32, #tpu.memory_space<vmem>>, vector<16x128xf32>
      %cst_12 = arith.constant 1.250000e-01 : f32
      %13 = vector.broadcast %cst_12 : f32 to vector<16x128xf32>
      %14 = arith.mulf %12, %13 : vector<16x128xf32>
      %c0_13 = arith.constant 0 : index
      %c0_14 = arith.constant 0 : index
      %15 = vector.load %arg5[%c0_13, %c0_14] : memref<16x128xf32, #tpu.memory_space<vmem>>, vector<16x128xf32>
      tpu.vector_store %arg5[%c0_13, %c0_14], %14 {strides = array<i32>} : memref<16x128xf32, #tpu.memory_space<vmem>>, vector<16x128xf32>,
    } else {
    }
    return
  }
  func.func @transform_0(%arg0: i32, %arg1: i32, %arg2: i32) -> (i32, i32) {
    %c0_i32 = arith.constant 0 : i32
    return %arg0, %arg2 : i32, i32
  }
  func.func @transform_1(%arg0: i32, %arg1: i32, %arg2: i32) -> (i32, i32) {
    %c0_i32 = arith.constant 0 : i32
    return %arg2, %arg1 : i32, i32
  }
  func.func @transform_2(%arg0: i32, %arg1: i32, %arg2: i32) -> (i32, i32) {
    %c0_i32 = arith.constant 0 : i32
    return %arg0, %arg1 : i32, i32
  }
}

</mosaic_0001>

<bundles_post_ra>
// kernel: mul.13
= control target key start
LH: loop header
LB: loop body
LE: loop exit
PB: predicated region body
PF: predicated region fallthrough
CT: control target
= control target key end

     0   :  { %s34_s0 = inlined_call_operand.vmem [shape: f32[56], index: 0, kind: input, shape index: {}]   ;;  %s35_s1 = inlined_call_operand.vmem [shape: f32[56], index: 1, kind: input, shape index: {}]   ;;  %s36_s2 = inlined_call_operand.vmem [shape: f32[56], index: 2, kind: output, shape index: {}]  }
   0x1   :  { %v3_v0 = vld [vmem:[%s34_s0] sm:$0x1] }
   0x2   :  { %v4_v1 = vld [vmem:[%s35_s1] sm:$0x1] }
   0x3   :  { %v7_v2 = vmul.f32 %v4_v1, %v3_v0 }
   0x5   :  { %9 = vst [vmem:[%s36_s2] sm:$0x1] %v7_v2 }

// kernel: interactive_gcn_forward.12
= control target key start
LH: loop header
LB: loop body
LE: loop exit
PB: predicated region body
PF: predicated region fallthrough
CT: control target
= control target key end

     0   :  { %v197_v0 = vmov 0.0   ;;  %vm198_vm0 = vmmov 0   ;;  %s247_s1 = inlined_call_operand.vmem [shape: bf16[128,128], index: 1, kind: input, shape index: {}]   ;;  %s248_s0 = inlined_call_operand.vmem [shape: bf16[16,128], index: 0, kind: input, shape index: {}]   ;;  %s249_s2 = inlined_call_operand.vmem [shape: f32[16,128], index: 2, kind: output, shape index: {}]  }
   0x1   :  { %166 = vmatprep.subr.bf16.mxu0 %v197_v0  ;;  %v188_v1 = vld [vmem:[%s247_s1] sm:$0xff]   ;;  %182 = vmatprep.mubr.msk.bf16.mxu0 %vm198_vm0, %v197_v0  ;;  %v189_v2 = vld [vmem:[%s247_s1 + $0x8] sm:$0xff]   ;;  %v190_v3 = vld [vmem:[%s247_s1 + $0x10] sm:$0xff]  }
   0x2   :  { %167 = vmatpush3.bf16.msra.mxu0 %v188_v1  ;;  %v191_v4 = vld [vmem:[%s247_s1 + $0x18] sm:$0xff]   ;;  %v192_v5 = vld [vmem:[%s247_s1 + $0x20] sm:$0xff]   ;;  %v193_v6 = vld [vmem:[%s247_s1 + $0x28] sm:$0xff]  }
   0x3   :  { %168 = vmatprep.subr.bf16.mxu0 %v197_v0  ;;  %v194_v7 = vld [vmem:[%s247_s1 + $0x30] sm:$0xff]   ;;  %v195_v8 = vld [vmem:[%s247_s1 + $0x38] sm:$0xff]   ;;  %v196_v9 = vld [vmem:[%s248_s0] sm:$0xff]  }
   0x6   :  { %169 = vmatpush3.bf16.msra.mxu0 %v189_v2 }
   0x7   :  { %170 = vmatprep.subr.bf16.mxu0 %v197_v0 }
   0xa   :  { %171 = vmatpush3.bf16.msra.mxu0 %v190_v3 }
   0xb   :  { %172 = vmatprep.subr.bf16.mxu0 %v197_v0 }
   0xe   :  { %173 = vmatpush3.bf16.msra.mxu0 %v191_v4 }
   0xf   :  { %174 = vmatprep.subr.bf16.mxu0 %v197_v0 }
  0x12   :  { %175 = vmatpush3.bf16.msra.mxu0 %v192_v5 }
  0x13   :  { %176 = vmatprep.subr.bf16.mxu0 %v197_v0 }
  0x16   :  { %177 = vmatpush3.bf16.msra.mxu0 %v193_v6 }
  0x17   :  { %178 = vmatprep.subr.bf16.mxu0 %v197_v0 }
  0x1a   :  { %179 = vmatpush3.bf16.msra.mxu0 %v194_v7 }
  0x1b   :  { %180 = vmatprep.subr.bf16.mxu0 %v197_v0 }
  0x1e   :  { %181 = vmatpush3.bf16.msra.mxu0 %v195_v8 }
  0x21   :  { %183 = vmatmul.mubr.bf16.vlgmr.msra.gmra.mrb[0].mxu0 %v196_v9 }
  0xf4   :  { %v126_v10 = vpop.f32.mrb[0].mxu0 }
  0xf5   :  { %142 = vst [vmem:[%s249_s2] sm:$0xff] %v126_v10  ;;  %v184_v11 = vpop.f32.mrb[1].mxu0 }
  0xf6   :  { %v129_v12 = vpop.f32.mrb[2].mxu0 }
  0xf7   :  { %143 = vst [vmem:[%s249_s2 + $0x8] sm:$0xff] %v129_v12  ;;  %v185_v13 = vpop.f32.mrb[3].mxu0 }

// kernel: interactive_gcn_forward.10
= control target key start
LH: loop header
LB: loop body
LE: loop exit
PB: predicated region body
PF: predicated region fallthrough
CT: control target
= control target key end

     0   :  { %v409_v0 = vmov 0.0   ;;  %vm410_vm0 = vmmov 0   ;;  %s504_s3 = inlined_call_operand.vmem [shape: bf16[128,128], index: 3, kind: input, shape index: {}]   ;;  %s505_s1 = inlined_call_operand.vmem [shape: bf16[128,128], index: 1, kind: input, shape index: {}]   ;;  %s506_s0 = inlined_call_operand.vmem [shape: bf16[16,128], index: 0, kind: input, shape index: {}]   ;;  %s507_s2 = inlined_call_operand.vmem [shape: bf16[16,128], index: 2, kind: input, shape index: {}]   ;;  %s508_s4 = inlined_call_operand.vmem [shape: f32[1,128], index: 4, kind: input, shape index: {}]   ;;  %s509_s5 = inlined_call_operand.vmem [shape: f32[16,128], index: 5, kind: output, shape index: {}]  }
   0x1   :  { %360 = vmatprep.subr.bf16.mxu1 %v409_v0  ;;  %v382_v1 = vld [vmem:[%s504_s3] sm:$0xff]   ;;  %340 = vmatprep.subr.bf16.mxu0 %v409_v0  ;;  %v383_v2 = vld [vmem:[%s504_s3 + $0x8] sm:$0xff]   ;;  %v384_v3 = vld [vmem:[%s504_s3 + $0x10] sm:$0xff]  }
   0x2   :  { %376 = vmatprep.mubr.msk.bf16.mxu1 %vm410_vm0, %v409_v0  ;;  %356 = vmatprep.mubr.msk.bf16.mxu0 %vm410_vm0, %v409_v0  ;;  %v389_v4 = vld [vmem:[%s505_s1] sm:$0xff]   ;;  %v391_v5 = vld [vmem:[%s505_s1 + $0x8] sm:$0xff]   ;;  %v385_v6 = vld [vmem:[%s504_s3 + $0x18] sm:$0xff]  }
   0x3   :  { %361 = vmatpush3.bf16.msra.mxu1 %v382_v1  ;;  %341 = vmatpush3.bf16.msra.mxu0 %v389_v4  ;;  %v393_v7 = vld [vmem:[%s505_s1 + $0x10] sm:$0xff]   ;;  %v386_v8 = vld [vmem:[%s504_s3 + $0x20] sm:$0xff]   ;;  %v394_v9 = vld [vmem:[%s505_s1 + $0x18] sm:$0xff]  }
   0x4   :  { %362 = vmatprep.subr.bf16.mxu1 %v409_v0  ;;  %342 = vmatprep.subr.bf16.mxu0 %v409_v0  ;;  %v387_v10 = vld [vmem:[%s504_s3 + $0x28] sm:$0xff]   ;;  %v395_v11 = vld [vmem:[%s505_s1 + $0x20] sm:$0xff]   ;;  %v388_v12 = vld [vmem:[%s504_s3 + $0x30] sm:$0xff]  }
   0x5   :  { %v396_v13 = vld [vmem:[%s505_s1 + $0x28] sm:$0xff]   ;;  %v390_v14 = vld [vmem:[%s504_s3 + $0x38] sm:$0xff]   ;;  %v153_v15 = vld [vmem:[%s507_s2] sm:$0xff]  }
   0x6   :  { %v397_v16 = vld [vmem:[%s505_s1 + $0x30] sm:$0xff]   ;;  %v398_v17 = vld [vmem:[%s505_s1 + $0x38] sm:$0xff]   ;;  %v399_v18 = vld [vmem:[%s506_s0] sm:$0xff]   ;;  %v155_v37 = vunpack.c.l.bf16 %v153_v15  ;;  %v156_v40 = vunpack.c.h.bf16 %v153_v15 }
   0x7   :  { %363 = vmatpush3.bf16.msra.mxu1 %v383_v2  ;;  %343 = vmatpush3.bf16.msra.mxu0 %v391_v5  ;;  %v310_v19 = vld [vmem:[%s508_s4] ss:$0 sm:$0xff] }
   0x8   :  { %364 = vmatprep.subr.bf16.mxu1 %v409_v0  ;;  %344 = vmatprep.subr.bf16.mxu0 %v409_v0 }
   0xb   :  { %365 = vmatpush3.bf16.msra.mxu1 %v384_v3  ;;  %345 = vmatpush3.bf16.msra.mxu0 %v393_v7 }
   0xc   :  { %366 = vmatprep.subr.bf16.mxu1 %v409_v0  ;;  %346 = vmatprep.subr.bf16.mxu0 %v409_v0 }
   0xf   :  { %367 = vmatpush3.bf16.msra.mxu1 %v385_v6  ;;  %347 = vmatpush3.bf16.msra.mxu0 %v394_v9 }
  0x10   :  { %368 = vmatprep.subr.bf16.mxu1 %v409_v0  ;;  %348 = vmatprep.subr.bf16.mxu0 %v409_v0 }
  0x13   :  { %369 = vmatpush3.bf16.msra.mxu1 %v386_v8  ;;  %349 = vmatpush3.bf16.msra.mxu0 %v395_v11 }
  0x14   :  { %370 = vmatprep.subr.bf16.mxu1 %v409_v0  ;;  %350 = vmatprep.subr.bf16.mxu0 %v409_v0 }
  0x17   :  { %371 = vmatpush3.bf16.msra.mxu1 %v387_v10  ;;  %351 = vmatpush3.bf16.msra.mxu0 %v396_v13 }
  0x18   :  { %372 = vmatprep.subr.bf16.mxu1 %v409_v0  ;;  %352 = vmatprep.subr.bf16.mxu0 %v409_v0 }
  0x1b   :  { %373 = vmatpush3.bf16.msra.mxu1 %v388_v12  ;;  %353 = vmatpush3.bf16.msra.mxu0 %v397_v16 }
  0x1c   :  { %374 = vmatprep.subr.bf16.mxu1 %v409_v0  ;;  %354 = vmatprep.subr.bf16.mxu0 %v409_v0 }
  0x1f   :  { %375 = vmatpush3.bf16.msra.mxu1 %v390_v14  ;;  %355 = vmatpush3.bf16.msra.mxu0 %v398_v17 }
  0x22   :  { %377 = vmatmul.mubr.bf16.vlgmr.msra.gmra.mrb[0].mxu1 %v153_v15  ;;  %357 = vmatmul.mubr.bf16.vlgmr.msra.gmra.mrb[0].mxu0 %v399_v18 }
  0xf5   :  { %v268_v20 = vpop.f32.mrb[0].mxu1  ;;  %v135_v28 = vpop.f32.mrb[0].mxu0 }
  0xf6   :  { %v269_v21 = vadd.f32 %v310_v19, %v268_v20  ;;  %v378_v22 = vpop.f32.mrb[1].mxu1  ;;  %v358_v29 = vpop.f32.mrb[1].mxu0  ;;  %v151_v36 = vmax.f32 %v135_v28, 0.0 }
  0xf7   :  { %v271_v23 = vpop.f32.mrb[2].mxu1  ;;  %v138_v30 = vpop.f32.mrb[2].mxu0 }
  0xf8   :  { %v320_v24 = vmul.f32 -1.442695, %v269_v21  ;;  %v272_v25 = vadd.f32 %v310_v19, %v271_v23  ;;  %v379_v26 = vpop.f32.mrb[3].mxu1  ;;  %v359_v31 = vpop.f32.mrb[3].mxu0  ;;  %v152_v38 = vmax.f32 %v138_v30, 0.0 }
  0xfa   :  { %401 = vpow2.f32 %v320_v24  ;;  %v321_v27 = vmul.f32 -1.442695, %v272_v25 }
  0xfc   :  { %403 = vpow2.f32 %v321_v27 }
 0x104   :  { %v402_v32 = vpop.eup %401 }
 0x105   :  { %v281_v33 = vadd.f32 1.0, %v402_v32 }
 0x106   :  { %v404_v34 = vpop.eup %403 }
 0x107   :  { %405 = vrcp.f32 %v281_v33  ;;  %v282_v35 = vadd.f32 1.0, %v404_v34 }
 0x109   :  { %407 = vrcp.f32 %v282_v35 }
 0x111   :  { %v406_v39 = vpop.eup %405 }
 0x112   :  { %v287_v41 = vmul.f32 %v406_v39, %v151_v36  ;;  %v289_v42 = vsub.f32 1.0, %v406_v39 }
 0x113   :  { %v408_v43 = vpop.eup %407 }
 0x114   :  { %v291_v44 = vmul.f32 %v289_v42, %v155_v37  ;;  %v288_v45 = vmul.f32 %v408_v43, %v152_v38  ;;  %v290_v46 = vsub.f32 1.0, %v408_v43 }
 0x116   :  { %v293_v47 = vadd.f32 %v291_v44, %v287_v41  ;;  %v292_v48 = vmul.f32 %v290_v46, %v156_v40 }
 0x118   :  { %295 = vst [vmem:[%s509_s5] sm:$0xff] %v293_v47  ;;  %v294_v49 = vadd.f32 %v292_v48, %v288_v45 }
 0x11a   :  { %296 = vst [vmem:[%s509_s5 + $0x8] sm:$0xff] %v294_v49 }

// kernel: interactive_gcn_forward.13
= control target key start
LH: loop header
LB: loop body
LE: loop exit
PB: predicated region body
PF: predicated region fallthrough
CT: control target
= control target key end

     0   :  { %s283_s1 = inlined_call_operand.vmem [shape: bf16[128,128], index: 1, kind: input, shape index: {}]   ;;  %s284_s0 = inlined_call_operand.vmem [shape: bf16[32,128], index: 0, kind: input, shape index: {}]   ;;  %s285_s2 = inlined_call_operand.vmem [shape: f32[32,128], index: 2, kind: output, shape index: {}]  }
   0x1   :  { %v216_v0 = vld [vmem:[%s283_s1] sm:$0xff]   ;;  %v217_v1 = vld [vmem:[%s283_s1 + $0x8] sm:$0xff]   ;;  %v218_v2 = vld [vmem:[%s283_s1 + $0x10] sm:$0xff]  }
   0x2   :  { %196 = vmatprep.subr.bf16.mxu0 %v216_v0  ;;  %v219_v3 = vld [vmem:[%s283_s1 + $0x18] sm:$0xff]   ;;  %v224_v4 = vld [vmem:[%s284_s0] sm:$0xff]   ;;  %v221_v6 = vld [vmem:[%s283_s1 + $0x28] sm:$0xff]  }
   0x3   :  { %197 = vmatpush3.bf16.msra.mxu0 %v216_v0  ;;  %212 = vmatprep.mubr.bf16.mxu0 %v224_v4  ;;  %v220_v5 = vld [vmem:[%s283_s1 + $0x20] sm:$0xff]   ;;  %v222_v7 = vld [vmem:[%s283_s1 + $0x30] sm:$0xff]   ;;  %v223_v8 = vld [vmem:[%s283_s1 + $0x38] sm:$0xff]  }
   0x4   :  { %198 = vmatprep.subr.bf16.mxu0 %v217_v1  ;;  %v225_v9 = vld [vmem:[%s284_s0 + $0x8] sm:$0xff]  }
   0x7   :  { %199 = vmatpush3.bf16.msra.mxu0 %v217_v1 }
   0x8   :  { %200 = vmatprep.subr.bf16.mxu0 %v218_v2 }
   0xb   :  { %201 = vmatpush3.bf16.msra.mxu0 %v218_v2 }
   0xc   :  { %202 = vmatprep.subr.bf16.mxu0 %v219_v3 }
   0xf   :  { %203 = vmatpush3.bf16.msra.mxu0 %v219_v3 }
  0x10   :  { %204 = vmatprep.subr.bf16.mxu0 %v220_v5 }
  0x13   :  { %205 = vmatpush3.bf16.msra.mxu0 %v220_v5 }
  0x14   :  { %206 = vmatprep.subr.bf16.mxu0 %v221_v6 }
  0x17   :  { %207 = vmatpush3.bf16.msra.mxu0 %v221_v6 }
  0x18   :  { %208 = vmatprep.subr.bf16.mxu0 %v222_v7 }
  0x1b   :  { %209 = vmatpush3.bf16.msra.mxu0 %v222_v7 }
  0x1c   :  { %210 = vmatprep.subr.bf16.mxu0 %v223_v8 }
  0x1f   :  { %211 = vmatpush3.bf16.msra.mxu0 %v223_v8 }
  0x22   :  { %213 = vmatmul.mubr.bf16.vlgmr.msra.gmra.mrb[0].mxu0 %v225_v9 }
  0xf5   :  { %v214_v10 = vpop.f32.mrb[0].mxu0 }
  0xf6   :  { %170 = vst [vmem:[%s285_s2 + $0x10] sm:$0xff] %v214_v10  ;;  %v138_v11 = vpop.f32.mrb[1].mxu0 }
  0xf7   :  { %168 = vst [vmem:[%s285_s2] sm:$0xff] %v138_v11  ;;  %v215_v12 = vpop.f32.mrb[2].mxu0 }
  0xf8   :  { %171 = vst [vmem:[%s285_s2 + $0x18] sm:$0xff] %v215_v12  ;;  %v141_v13 = vpop.f32.mrb[3].mxu0 }
  0xf9   :  { %169 = vst [vmem:[%s285_s2 + $0x8] sm:$0xff] %v141_v13 }

// kernel: interactive_gcn_forward.16
= control target key start
LH: loop header
LB: loop body
LE: loop exit
PB: predicated region body
PF: predicated region fallthrough
CT: control target
= control target key end

     0   :  { %v181_v0 = vmov 0.0   ;;  %vm182_vm0 = vmmov 0   ;;  %s228_s1 = inlined_call_operand.vmem [shape: bf16[128,128], index: 1, kind: input, shape index: {}]   ;;  %s229_s0 = inlined_call_operand.vmem [shape: bf16[8,128], index: 0, kind: input, shape index: {}]   ;;  %s230_s2 = inlined_call_operand.vmem [shape: f32[8,128], index: 2, kind: output, shape index: {}]  }
   0x1   :  { %151 = vmatprep.subr.bf16.mxu0 %v181_v0  ;;  %v173_v1 = vld [vmem:[%s228_s1] sm:$0xff]   ;;  %167 = vmatprep.mubr.msk.bf16.mxu0 %vm182_vm0, %v181_v0  ;;  %v174_v2 = vld [vmem:[%s228_s1 + $0x8] sm:$0xff]   ;;  %v175_v3 = vld [vmem:[%s228_s1 + $0x10] sm:$0xff]  }
   0x2   :  { %152 = vmatpush3.bf16.msra.mxu0 %v173_v1  ;;  %v176_v4 = vld [vmem:[%s228_s1 + $0x18] sm:$0xff]   ;;  %v177_v5 = vld [vmem:[%s228_s1 + $0x20] sm:$0xff]   ;;  %v178_v6 = vld [vmem:[%s228_s1 + $0x28] sm:$0xff]  }
   0x3   :  { %153 = vmatprep.subr.bf16.mxu0 %v181_v0  ;;  %v179_v7 = vld [vmem:[%s228_s1 + $0x30] sm:$0xff]   ;;  %v180_v8 = vld [vmem:[%s228_s1 + $0x38] sm:$0xff]   ;;  %v18_v9 = vld [vmem:[%s229_s0] sm:$0xf] }
   0x6   :  { %154 = vmatpush3.bf16.msra.mxu0 %v174_v2 }
   0x7   :  { %155 = vmatprep.subr.bf16.mxu0 %v181_v0 }
   0xa   :  { %156 = vmatpush3.bf16.msra.mxu0 %v175_v3 }
   0xb   :  { %157 = vmatprep.subr.bf16.mxu0 %v181_v0 }
   0xe   :  { %158 = vmatpush3.bf16.msra.mxu0 %v176_v4 }
   0xf   :  { %159 = vmatprep.subr.bf16.mxu0 %v181_v0 }
  0x12   :  { %160 = vmatpush3.bf16.msra.mxu0 %v177_v5 }
  0x13   :  { %161 = vmatprep.subr.bf16.mxu0 %v181_v0 }
  0x16   :  { %162 = vmatpush3.bf16.msra.mxu0 %v178_v6 }
  0x17   :  { %163 = vmatprep.subr.bf16.mxu0 %v181_v0 }
  0x1a   :  { %164 = vmatpush3.bf16.msra.mxu0 %v179_v7 }
  0x1b   :  { %165 = vmatprep.subr.bf16.mxu0 %v181_v0 }
  0x1e   :  { %166 = vmatpush3.bf16.msra.mxu0 %v180_v8 }
  0x21   :  { %168 = vmatmul.mubr.bf16.vlgmr.msra.gmra.mrb[0].mxu0 %v18_v9 }
  0xf4   :  { %v117_v10 = vpop.f32.mrb[0].mxu0 }
  0xf5   :  { %129 = vst [vmem:[%s230_s2] sm:$0xff] %v117_v10  ;;  %v169_v11 = vpop.f32.mrb[1].mxu0 }
  0xf6   :  { %v120_v12 = vpop.f32.mrb[2].mxu0 }
  0xf7   :  { %v170_v13 = vpop.f32.mrb[3].mxu0 }

// kernel: interactive_gcn_forward.14
= control target key start
LH: loop header
LB: loop body
LE: loop exit
PB: predicated region body
PF: predicated region fallthrough
CT: control target
= control target key end

     0   :  { %v342_v0 = vmov 0.0   ;;  %vm343_vm0 = vmmov 0   ;;  %s426_s1 = inlined_call_operand.vmem [shape: bf16[128,128], index: 1, kind: input, shape index: {}]   ;;  %s427_s3 = inlined_call_operand.vmem [shape: bf16[128,128], index: 3, kind: input, shape index: {}]   ;;  %s428_s0 = inlined_call_operand.vmem [shape: bf16[8,128], index: 0, kind: input, shape index: {}]   ;;  %s429_s2 = inlined_call_operand.vmem [shape: bf16[8,128], index: 2, kind: input, shape index: {}]   ;;  %s430_s4 = inlined_call_operand.vmem [shape: f32[8,128], index: 4, kind: output, shape index: {}]  }
   0x1   :  { %283 = vmatprep.subr.bf16.mxu1 %v342_v0  ;;  %303 = vmatprep.subr.bf16.mxu0 %v342_v0  ;;  %v326_v1 = vld [vmem:[%s426_s1] sm:$0xff]   ;;  %v328_v3 = vld [vmem:[%s426_s1 + $0x8] sm:$0xff]   ;;  %v330_v5 = vld [vmem:[%s426_s1 + $0x10] sm:$0xff]  }
   0x2   :  { %v327_v2 = vld [vmem:[%s427_s3] sm:$0xff]   ;;  %299 = vmatprep.mubr.msk.bf16.mxu1 %vm343_vm0, %v342_v0  ;;  %319 = vmatprep.mubr.msk.bf16.mxu0 %vm343_vm0, %v342_v0  ;;  %v329_v4 = vld [vmem:[%s427_s3 + $0x8] sm:$0xff]   ;;  %v331_v6 = vld [vmem:[%s427_s3 + $0x10] sm:$0xff]  }
   0x3   :  { %284 = vmatpush3.bf16.msra.mxu1 %v326_v1  ;;  %304 = vmatpush3.bf16.msra.mxu0 %v327_v2  ;;  %v332_v7 = vld [vmem:[%s426_s1 + $0x18] sm:$0xff]   ;;  %v334_v9 = vld [vmem:[%s426_s1 + $0x20] sm:$0xff]   ;;  %v336_v11 = vld [vmem:[%s426_s1 + $0x28] sm:$0xff]  }
   0x4   :  { %285 = vmatprep.subr.bf16.mxu1 %v342_v0  ;;  %305 = vmatprep.subr.bf16.mxu0 %v342_v0  ;;  %v333_v8 = vld [vmem:[%s427_s3 + $0x18] sm:$0xff]   ;;  %v335_v10 = vld [vmem:[%s427_s3 + $0x20] sm:$0xff]   ;;  %v337_v12 = vld [vmem:[%s427_s3 + $0x28] sm:$0xff]  }
   0x5   :  { %v338_v13 = vld [vmem:[%s426_s1 + $0x30] sm:$0xff]   ;;  %v340_v15 = vld [vmem:[%s426_s1 + $0x38] sm:$0xff]   ;;  %v24_v17 = vld [vmem:[%s428_s0] sm:$0xf] }
   0x6   :  { %v339_v14 = vld [vmem:[%s427_s3 + $0x30] sm:$0xff]   ;;  %v341_v16 = vld [vmem:[%s427_s3 + $0x38] sm:$0xff]   ;;  %v132_v18 = vld [vmem:[%s429_s2] sm:$0xf] }
   0x7   :  { %286 = vmatpush3.bf16.msra.mxu1 %v328_v3  ;;  %306 = vmatpush3.bf16.msra.mxu0 %v329_v4 }
   0x8   :  { %287 = vmatprep.subr.bf16.mxu1 %v342_v0  ;;  %307 = vmatprep.subr.bf16.mxu0 %v342_v0 }
   0xb   :  { %288 = vmatpush3.bf16.msra.mxu1 %v330_v5  ;;  %308 = vmatpush3.bf16.msra.mxu0 %v331_v6 }
   0xc   :  { %289 = vmatprep.subr.bf16.mxu1 %v342_v0  ;;  %309 = vmatprep.subr.bf16.mxu0 %v342_v0 }
   0xf   :  { %290 = vmatpush3.bf16.msra.mxu1 %v332_v7  ;;  %310 = vmatpush3.bf16.msra.mxu0 %v333_v8 }
  0x10   :  { %291 = vmatprep.subr.bf16.mxu1 %v342_v0  ;;  %311 = vmatprep.subr.bf16.mxu0 %v342_v0 }
  0x13   :  { %292 = vmatpush3.bf16.msra.mxu1 %v334_v9  ;;  %312 = vmatpush3.bf16.msra.mxu0 %v335_v10 }
  0x14   :  { %293 = vmatprep.subr.bf16.mxu1 %v342_v0  ;;  %313 = vmatprep.subr.bf16.mxu0 %v342_v0 }
  0x17   :  { %294 = vmatpush3.bf16.msra.mxu1 %v336_v11  ;;  %314 = vmatpush3.bf16.msra.mxu0 %v337_v12 }
  0x18   :  { %295 = vmatprep.subr.bf16.mxu1 %v342_v0  ;;  %315 = vmatprep.subr.bf16.mxu0 %v342_v0 }
  0x1b   :  { %296 = vmatpush3.bf16.msra.mxu1 %v338_v13  ;;  %316 = vmatpush3.bf16.msra.mxu0 %v339_v14 }
  0x1c   :  { %297 = vmatprep.subr.bf16.mxu1 %v342_v0  ;;  %317 = vmatprep.subr.bf16.mxu0 %v342_v0 }
  0x1f   :  { %298 = vmatpush3.bf16.msra.mxu1 %v340_v15  ;;  %318 = vmatpush3.bf16.msra.mxu0 %v341_v16 }
  0x22   :  { %300 = vmatmul.mubr.bf16.vlgmr.msra.gmra.mrb[0].mxu1 %v24_v17  ;;  %320 = vmatmul.mubr.bf16.vlgmr.msra.gmra.mrb[0].mxu0 %v132_v18 }
  0xf5   :  { %v123_v19 = vpop.f32.mrb[0].mxu1  ;;  %v231_v20 = vpop.f32.mrb[0].mxu0 }
  0xf6   :  { %v301_v21 = vpop.f32.mrb[1].mxu1  ;;  %v237_v22 = vadd.f32 %v231_v20, %v123_v19  ;;  %v321_v23 = vpop.f32.mrb[1].mxu0 }
  0xf7   :  { %v126_v24 = vpop.f32.mrb[2].mxu1  ;;  %v234_v25 = vpop.f32.mrb[2].mxu0 }
  0xf8   :  { %v302_v26 = vpop.f32.mrb[3].mxu1  ;;  %v243_v27 = vmul.f32 0.25, %v237_v22  ;;  %v322_v28 = vpop.f32.mrb[3].mxu0 }
  0xfa   :  { %244 = vst [vmem:[%s430_s4] sm:$0xff] %v243_v27 }

// kernel: interactive_gcn_forward.17
= control target key start
LH: loop header
LB: loop body
LE: loop exit
PB: predicated region body
PF: predicated region fallthrough
CT: control target
= control target key end

     0   :  { %s287_s1 = inlined_call_operand.vmem [shape: bf16[128,128], index: 1, kind: input, shape index: {}]   ;;  %s288_s0 = inlined_call_operand.vmem [shape: bf16[32,128], index: 0, kind: input, shape index: {}]   ;;  %s289_s2 = inlined_call_operand.vmem [shape: f32[32,128], index: 2, kind: output, shape index: {}]  }
   0x1   :  { %v220_v0 = vld [vmem:[%s287_s1] sm:$0xff]   ;;  %v221_v1 = vld [vmem:[%s287_s1 + $0x8] sm:$0xff]   ;;  %v222_v2 = vld [vmem:[%s287_s1 + $0x10] sm:$0xff]  }
   0x2   :  { %200 = vmatprep.subr.bf16.mxu0 %v220_v0  ;;  %v223_v3 = vld [vmem:[%s287_s1 + $0x18] sm:$0xff]   ;;  %v228_v4 = vld [vmem:[%s288_s0] sm:$0xff]   ;;  %v225_v6 = vld [vmem:[%s287_s1 + $0x28] sm:$0xff]  }
   0x3   :  { %201 = vmatpush3.bf16.msra.mxu0 %v220_v0  ;;  %216 = vmatprep.mubr.bf16.mxu0 %v228_v4  ;;  %v224_v5 = vld [vmem:[%s287_s1 + $0x20] sm:$0xff]   ;;  %v226_v7 = vld [vmem:[%s287_s1 + $0x30] sm:$0xff]   ;;  %v227_v8 = vld [vmem:[%s287_s1 + $0x38] sm:$0xff]  }
   0x4   :  { %202 = vmatprep.subr.bf16.mxu0 %v221_v1  ;;  %v229_v9 = vld [vmem:[%s288_s0 + $0x8] sm:$0xff]  }
   0x7   :  { %203 = vmatpush3.bf16.msra.mxu0 %v221_v1 }
   0x8   :  { %204 = vmatprep.subr.bf16.mxu0 %v222_v2 }
   0xb   :  { %205 = vmatpush3.bf16.msra.mxu0 %v222_v2 }
   0xc   :  { %206 = vmatprep.subr.bf16.mxu0 %v223_v3 }
   0xf   :  { %207 = vmatpush3.bf16.msra.mxu0 %v223_v3 }
  0x10   :  { %208 = vmatprep.subr.bf16.mxu0 %v224_v5 }
  0x13   :  { %209 = vmatpush3.bf16.msra.mxu0 %v224_v5 }
  0x14   :  { %210 = vmatprep.subr.bf16.mxu0 %v225_v6 }
  0x17   :  { %211 = vmatpush3.bf16.msra.mxu0 %v225_v6 }
  0x18   :  { %212 = vmatprep.subr.bf16.mxu0 %v226_v7 }
  0x1b   :  { %213 = vmatpush3.bf16.msra.mxu0 %v226_v7 }
  0x1c   :  { %214 = vmatprep.subr.bf16.mxu0 %v227_v8 }
  0x1f   :  { %215 = vmatpush3.bf16.msra.mxu0 %v227_v8 }
  0x22   :  { %217 = vmatmul.mubr.bf16.vlgmr.msra.gmra.mrb[0].mxu0 %v229_v9 }
  0xf5   :  { %v218_v10 = vpop.f32.mrb[0].mxu0 }
  0xf6   :  { %v170_v11 = vmul.f32 0.125, %v218_v10  ;;  %v138_v12 = vpop.f32.mrb[1].mxu0 }
  0xf7   :  { %v168_v13 = vmul.f32 0.125, %v138_v12  ;;  %v219_v14 = vpop.f32.mrb[2].mxu0 }
  0xf8   :  { %174 = vst [vmem:[%s289_s2 + $0x10] sm:$0xff] %v170_v11  ;;  %v171_v15 = vmul.f32 0.125, %v219_v14  ;;  %v141_v16 = vpop.f32.mrb[3].mxu0 }
  0xf9   :  { %172 = vst [vmem:[%s289_s2] sm:$0xff] %v168_v13  ;;  %v169_v17 = vmul.f32 0.125, %v141_v16 }
  0xfa   :  { %175 = vst [vmem:[%s289_s2 + $0x18] sm:$0xff] %v171_v15 }
  0xfb   :  { %173 = vst [vmem:[%s289_s2 + $0x8] sm:$0xff] %v169_v17 }

// kernel: interactive_gcn_forward.19
= control target key start
LH: loop header
LB: loop body
LE: loop exit
PB: predicated region body
PF: predicated region fallthrough
CT: control target
= control target key end

     0   :  { %v199_v0 = vmov 0.0   ;;  %vm200_vm0 = vmmov 0   ;;  %s249_s1 = inlined_call_operand.vmem [shape: bf16[128,128], index: 1, kind: input, shape index: {}]   ;;  %s250_s0 = inlined_call_operand.vmem [shape: bf16[16,128], index: 0, kind: input, shape index: {}]   ;;  %s251_s2 = inlined_call_operand.vmem [shape: f32[16,128], index: 2, kind: output, shape index: {}]  }
   0x1   :  { %168 = vmatprep.subr.bf16.mxu0 %v199_v0  ;;  %v190_v1 = vld [vmem:[%s249_s1] sm:$0xff]   ;;  %184 = vmatprep.mubr.msk.bf16.mxu0 %vm200_vm0, %v199_v0  ;;  %v191_v2 = vld [vmem:[%s249_s1 + $0x8] sm:$0xff]   ;;  %v192_v3 = vld [vmem:[%s249_s1 + $0x10] sm:$0xff]  }
   0x2   :  { %169 = vmatpush3.bf16.msra.mxu0 %v190_v1  ;;  %v193_v4 = vld [vmem:[%s249_s1 + $0x18] sm:$0xff]   ;;  %v194_v5 = vld [vmem:[%s249_s1 + $0x20] sm:$0xff]   ;;  %v195_v6 = vld [vmem:[%s249_s1 + $0x28] sm:$0xff]  }
   0x3   :  { %170 = vmatprep.subr.bf16.mxu0 %v199_v0  ;;  %v196_v7 = vld [vmem:[%s249_s1 + $0x30] sm:$0xff]   ;;  %v197_v8 = vld [vmem:[%s249_s1 + $0x38] sm:$0xff]   ;;  %v198_v9 = vld [vmem:[%s250_s0] sm:$0xff]  }
   0x6   :  { %171 = vmatpush3.bf16.msra.mxu0 %v191_v2 }
   0x7   :  { %172 = vmatprep.subr.bf16.mxu0 %v199_v0 }
   0xa   :  { %173 = vmatpush3.bf16.msra.mxu0 %v192_v3 }
   0xb   :  { %174 = vmatprep.subr.bf16.mxu0 %v199_v0 }
   0xe   :  { %175 = vmatpush3.bf16.msra.mxu0 %v193_v4 }
   0xf   :  { %176 = vmatprep.subr.bf16.mxu0 %v199_v0 }
  0x12   :  { %177 = vmatpush3.bf16.msra.mxu0 %v194_v5 }
  0x13   :  { %178 = vmatprep.subr.bf16.mxu0 %v199_v0 }
  0x16   :  { %179 = vmatpush3.bf16.msra.mxu0 %v195_v6 }
  0x17   :  { %180 = vmatprep.subr.bf16.mxu0 %v199_v0 }
  0x1a   :  { %181 = vmatpush3.bf16.msra.mxu0 %v196_v7 }
  0x1b   :  { %182 = vmatprep.subr.bf16.mxu0 %v199_v0 }
  0x1e   :  { %183 = vmatpush3.bf16.msra.mxu0 %v197_v8 }
  0x21   :  { %185 = vmatmul.mubr.bf16.vlgmr.msra.gmra.mrb[0].mxu0 %v198_v9 }
  0xf4   :  { %v126_v10 = vpop.f32.mrb[0].mxu0 }
  0xf5   :  { %v142_v11 = vmul.f32 0.125, %v126_v10  ;;  %v186_v12 = vpop.f32.mrb[1].mxu0 }
  0xf6   :  { %v129_v13 = vpop.f32.mrb[2].mxu0 }
  0xf7   :  { %144 = vst [vmem:[%s251_s2] sm:$0xff] %v142_v11  ;;  %v143_v14 = vmul.f32 0.125, %v129_v13  ;;  %v187_v15 = vpop.f32.mrb[3].mxu0 }
  0xf9   :  { %145 = vst [vmem:[%s251_s2 + $0x8] sm:$0xff] %v143_v14 }

</bundles_post_ra>
